<compile_context>
chip_gen: v7x
topology: tpu7x:2x2x1
jax: 0.10.0
libtpu: 0.0.40
codegen_flags: <defaults>
</compile_context>

<pallas_src>
import functools
import math

import jax
import jax.numpy as jnp
from jax.experimental import pallas as pl
from jax.experimental.pallas import tpu as pltpu

F32 = jnp.float32
# MXU operand dtype.  Accumulation and all elementwise math (sigmoid/tanh/rrelu)
# stay in f32 (v5e has no bf16 VPU/EUP path; f32 accumulate everywhere).
MXU_DTYPE = jnp.bfloat16
# F.rrelu default (eval mode) uses the mean negative slope.
# TODO(synk): train-mode RReLU samples a random slope per element; not modeled.
RRELU_SLOPE = (1.0 / 8.0 + 1.0 / 3.0) / 2.0

_LANE = 128


def _round_up(x, m=_LANE):
    return ((x + m - 1) // m) * m


def _pick_tile(n):
    # >=256 fills the 2x256^2 MXU on v6e/v7x; 128 already saturates v5e's 4x128^2.
    for cand in (512, 256, 128):
        if n % cand == 0:
            return cand
    # TODO(synk): for production graphs whose N is not 128-aligned, zero-pad N
    # (and mask padded nodes out of the top-k) instead of falling back to a
    # whole-array block.
    return n


def _pick_time_batch(t_total, per_t_bytes, budget=2 << 20):
    best = 1
    for tb in range(1, t_total + 1):
        if t_total % tb == 0 and tb * per_t_bytes <= budget:
            best = tb
    return best


def _vmem_limit(est_bytes):
    # Scoped-VMEM limit sized to the tile working set (default 16/32 MiB is far
    # below physical); clamp under v7x's 64 MiB physical VMEM.
    return int(min(max(2 * int(est_bytes), 32 * 1024 * 1024), 60 * 1024 * 1024))


# ----------------------------------------------------------------------------
# Pallas kernels
# ----------------------------------------------------------------------------
def _score_kernel(x_ref, s_ref, o_ref):
    # scores[t, n] = sum_d X[t, n, d] * scorer_normed[d]; Tb timesteps per step.
    x = x_ref[...].astype(F32)                        # (Tb, N, Dp)
    s = s_ref[...].astype(F32)                        # (1, Dp)
    prod = x * s[None, :, :]                          # VPU broadcast multiply
    o_ref[...] = jnp.sum(prod, axis=-1)[:, None, :]   # (Tb, 1, N) lane-dense


def _evolve_kernel(z_ref, w0_ref, wur_ref, bur_ref, wuh_ref, bh_ref,
                   w_out_ref, w_acc, zq_buf, *, din_pad):
    # mat_GRU_cell applied to the GCN weight matrix; one grid step per timestep.
    # f32 carry lives in `w_acc` across the whole time grid; stacked bf16 gate
    # tensors have constant index_maps -> DMA'd once, VMEM-resident over all T.
    @pl.when(pl.program_id(0) == 0)
    def _init():
        w_acc[...] = w0_ref[...]

    q = w_acc[...]                                    # (Dp, Dop) f32 carry
    zq_buf[:din_pad, :] = z_ref[...]                  # z (bf16)
    zq_buf[din_pad:, :] = q.astype(MXU_DTYPE)         # q (bf16 for MXU only)

    # update|reset in one stacked MXU call: (2Dp,2Dp) @ (2Dp,Dop), f32 accumulate.
    ur = jnp.dot(wur_ref[...], zq_buf[...], preferred_element_type=F32) + bur_ref[...]
    gates = jax.nn.sigmoid(ur)                        # f32
    update = gates[:din_pad, :]
    reset = gates[din_pad:, :]

    h_cap = reset * q
    zq_buf[din_pad:, :] = h_cap.astype(MXU_DTYPE)
    h_til = jnp.tanh(
        jnp.dot(wuh_ref[...], zq_buf[...], preferred_element_type=F32) + bh_ref[...])

    new_q = (1.0 - update) * q + update * h_til       # f32 recurrence
    w_acc[...] = new_q
    w_out_ref[...] = new_q.astype(w_out_ref.dtype)    # emitted bf16 for the GCN


def _gcn_kernel(a_ref, x_ref, w_ref, o_ref, acc_ref):
    # node_embs_t = rrelu(Ahat_t @ X_t @ W_t), tiled over (rows of A, K reduction).
    k = pl.program_id(2)

    @pl.when(k == 0)
    def _zero():
        acc_ref[...] = jnp.zeros_like(acc_ref)

    a = a_ref[...].astype(MXU_DTYPE)                  # in-kernel cast (VPU, free)
    x = x_ref[...].astype(MXU_DTYPE)
    acc_ref[...] += jnp.dot(a, x, preferred_element_type=F32)

    @pl.when(k == pl.num_programs(2) - 1)
    def _epilogue():
        ax = acc_ref[...].astype(MXU_DTYPE)
        h = jnp.dot(ax, w_ref[...], preferred_element_type=F32)
        o_ref[...] = jnp.where(h >= 0.0, h, h * RRELU_SLOPE).astype(o_ref.dtype)


# ----------------------------------------------------------------------------
# Pallas wrappers (one pallas_call per layer per stage, gridded over time)
# ----------------------------------------------------------------------------
def score_all(X_pad, scorer_row):
    """scores[t, n] for all T timesteps, Tb timesteps per grid step."""
    T, N, Dp = X_pad.shape
    per_t = N * Dp * X_pad.dtype.itemsize + N * 4
    tb = _pick_time_batch(T, per_t)
    est = 2 * tb * per_t + Dp * 4
    out = pl.pallas_call(
        _score_kernel,
        out_shape=jax.ShapeDtypeStruct((T, 1, N), F32),
        grid=(T // tb,),
        in_specs=[pl.BlockSpec((tb, N, Dp), lambda i: (i, 0, 0)),
                  pl.BlockSpec((1, Dp), lambda i: (0, 0))],
        out_specs=pl.BlockSpec((tb, 1, N), lambda i: (i, 0, 0)),
        compiler_params=pltpu.CompilerParams(
            dimension_semantics=("parallel",),
            vmem_limit_bytes=_vmem_limit(est)),
    )(X_pad, scorer_row)
    return out[:, 0, :]                               # [T, N]


def evolve_weights(z_topk, prep):
    """Run the mat_GRU_cell over all T timesteps; returns bf16 W_t for every t."""
    T, Dp, Dop = z_topk.shape
    step = lambda t: (t, 0, 0)
    const = lambda t: (0, 0)
    est = (2 * Dp * Dop * 2            # z blocks (bf16)
           + 2 * Dp * Dop * 4          # W0 (f32)
           + 2 * 4 * Dp * Dp * 2       # WUR (bf16)
           + 2 * 2 * Dp * Dop * 4      # bur (f32)
           + 2 * 2 * Dp * Dp * 2       # WUH (bf16)
           + 2 * Dp * Dop * 4          # bh (f32)
           + 2 * Dp * Dop * 2          # out blocks (bf16)
           + Dp * Dop * 4 + 2 * Dp * Dop * 2)         # scratches
    # TODO(synk): for Dout_pad >= 256, add a "parallel" grid axis over W columns
    # (carry scratch (Dp, td)) to shard the otherwise-serial recurrence across
    # v7x's two TensorCores.
    return pl.pallas_call(
        functools.partial(_evolve_kernel, din_pad=Dp),
        out_shape=jax.ShapeDtypeStruct((T, Dp, Dop), MXU_DTYPE),
        grid=(T,),
        in_specs=[pl.BlockSpec((None, Dp, Dop), step),   # z_topk_t (bf16)
                  pl.BlockSpec((Dp, Dop), const),         # W0 (f32)
                  pl.BlockSpec((2 * Dp, 2 * Dp), const),  # [[Wu Uu],[Wr Ur]] bf16
                  pl.BlockSpec((2 * Dp, Dop), const),     # [bu ; br] f32
                  pl.BlockSpec((Dp, 2 * Dp), const),      # [Wh Uh] bf16
                  pl.BlockSpec((Dp, Dop), const)],        # bh f32
        out_specs=pl.BlockSpec((None, Dp, Dop), step),
        scratch_shapes=[pltpu.VMEM((Dp, Dop), F32),             # f32 weight carry
                        pltpu.VMEM((2 * Dp, Dop), MXU_DTYPE)],  # stacked [z;*]
        compiler_params=pltpu.CompilerParams(
            dimension_semantics=("arbitrary",),
            vmem_limit_bytes=_vmem_limit(est)),
    )(z_topk, prep["W0"], prep["WUR"], prep["bur"], prep["WUH"], prep["bh"])


def gcn_all(A_stack, X_pad, W_all, out_dtype):
    """rrelu(Ahat_t @ X_t @ W_t) for all T; tiled (T, rows, K-reduction) grid."""
    T, N, _ = A_stack.shape
    Dp = X_pad.shape[-1]
    Dop = W_all.shape[-1]
    tm = _pick_tile(N)
    tk = tm
    out_size = jnp.dtype(out_dtype).itemsize
    est = (2 * tm * tk * A_stack.dtype.itemsize
           + 2 * tk * Dp * X_pad.dtype.itemsize
           + 2 * Dp * Dop * 2
           + 2 * tm * Dop * out_size
           + tm * Dp * 4)
    return pl.pallas_call(
        _gcn_kernel,
        out_shape=jax.ShapeDtypeStruct((T, N, Dop), out_dtype),
        grid=(T, N // tm, N // tk),
        in_specs=[pl.BlockSpec((None, tm, tk), lambda t, i, k: (t, i, k)),
                  pl.BlockSpec((None, tk, Dp), lambda t, i, k: (t, k, 0)),
                  pl.BlockSpec((None, Dp, Dop), lambda t, i, k: (t, 0, 0))],
        out_specs=pl.BlockSpec((None, tm, Dop), lambda t, i, k: (t, i, 0)),
        scratch_shapes=[pltpu.VMEM((tm, Dp), F32)],   # A@X accumulator
        compiler_params=pltpu.CompilerParams(
            dimension_semantics=("parallel", "parallel", "arbitrary"),
            vmem_limit_bytes=_vmem_limit(est)),
    )(A_stack, X_pad, W_all)


# ----------------------------------------------------------------------------
# Parameter prep: pad feature dims to 128 multiples, stack + bf16-cast the gates
# ----------------------------------------------------------------------------
def prepare_grcu(layer_params):
    W0_raw = layer_params["gcn_init"]                 # [Din, Dout]
    Din, Dout = W0_raw.shape
    Dp, Dop = _round_up(Din), _round_up(Dout)

    def pad2(m, r, c):
        return jnp.pad(m, ((0, r - m.shape[0]), (0, c - m.shape[1])))

    g = layer_params["gates"]
    WUR = jnp.concatenate(
        [jnp.concatenate([pad2(g["Wu"], Dp, Dp), pad2(g["Uu"], Dp, Dp)], axis=1),
         jnp.concatenate([pad2(g["Wr"], Dp, Dp), pad2(g["Ur"], Dp, Dp)], axis=1)],
        axis=0).astype(MXU_DTYPE)                     # (2Dp, 2Dp)
    WUH = jnp.concatenate([pad2(g["Wh"], Dp, Dp), pad2(g["Uh"], Dp, Dp)],
                          axis=1).astype(MXU_DTYPE)   # (Dp, 2Dp)
    bur = jnp.concatenate([pad2(g["bu"], Dp, Dop), pad2(g["br"], Dp, Dop)],
                          axis=0).astype(F32)         # (2Dp, Dop)
    bh = pad2(g["bh"], Dp, Dop).astype(F32)
    W0 = pad2(W0_raw, Dp, Dop).astype(F32)

    scorer = layer_params["scorer"]                   # [Din, 1]
    scorer_row = (scorer / jnp.linalg.norm(scorer)).reshape(1, Din)
    scorer_row = jnp.pad(scorer_row, ((0, 0), (0, Dp - Din)))

    return {"WUR": WUR, "WUH": WUH, "bur": bur, "bh": bh, "W0": W0,
            "scorer_row": scorer_row, "k": Dout, "din_pad": Dp, "dout_pad": Dop}


# ----------------------------------------------------------------------------
# Module forward
# ----------------------------------------------------------------------------
def grcu_forward(prep, A_stack, X_pad, out_dtype):
    Dp, Dop = prep["din_pad"], prep["dout_pad"]
    k = prep["k"]

    scores = score_all(X_pad, prep["scorer_row"])                     # [T, N]
    # TODO(synk): data-dependent top-k selection + row gather has no clean Pallas
    # equivalent; done once, batched over T, in plain JAX ahead of the fused kernels.
    vals, idx = jax.lax.top_k(scores, k)                              # [T, k]
    gathered = jnp.take_along_axis(X_pad, idx[:, :, None], axis=1)    # [T, k, Dp]
    z = gathered.astype(F32) * jnp.tanh(vals)[:, :, None]
    z = jnp.transpose(z, (0, 2, 1))                                   # [T, Dp, k] (small)
    if Dop > k:
        z = jnp.pad(z, ((0, 0), (0, 0), (0, Dop - k)))
    z = z.astype(MXU_DTYPE)                                           # [T, Dp, Dop] bf16

    W_all = evolve_weights(z, prep)                                   # [T, Dp, Dop] bf16
    return gcn_all(A_stack, X_pad, W_all, out_dtype)                  # [T, N, Dop]


def evolve_gcn_forward(params, A_stack, X_stack):
    T, N, Din = X_stack.shape
    preps = [prepare_grcu(lp) for lp in params["layers"]]

    # Pad the first layer's input features once; later layers are already emitted padded.
    Dp0 = preps[0]["din_pad"]
    X = jnp.pad(X_stack, ((0, 0), (0, 0), (0, Dp0 - Din))) if Dp0 > Din else X_stack

    n_layers = len(preps)
    for li, prep in enumerate(preps):
        last = li == n_layers - 1
        # Intermediate layers emit bf16 (next layer's MXU operands); final layer f32.
        X = grcu_forward(prep, A_stack, X, F32 if last else MXU_DTYPE)

    out_dim = params["layers"][-1]["gcn_init"].shape[1]
    return X[..., :out_dim]                                           # strip feature padding


# ----------------------------------------------------------------------------
# Deterministic parameter construction (mirrors reset_param uniform ranges)
# ----------------------------------------------------------------------------
def _uniform(key, shape, stdv):
    return jax.random.uniform(key, shape, F32, minval=-stdv, maxval=stdv)


def make_grcu_params(key, in_dim, out_dim):
    ks = jax.random.split(key, 11)
    s_in = 1.0 / math.sqrt(in_dim)
    s_out = 1.0 / math.sqrt(out_dim)
    gates = {
        "Wu": _uniform(ks[0], (in_dim, in_dim), s_in),
        "Uu": _uniform(ks[1], (in_dim, in_dim), s_in),
        "bu": _uniform(ks[2], (in_dim, out_dim), s_out),
        "Wr": _uniform(ks[3], (in_dim, in_dim), s_in),
        "Ur": _uniform(ks[4], (in_dim, in_dim), s_in),
        "br": _uniform(ks[5], (in_dim, out_dim), s_out),
        "Wh": _uniform(ks[6], (in_dim, in_dim), s_in),
        "Uh": _uniform(ks[7], (in_dim, in_dim), s_in),
        "bh": _uniform(ks[8], (in_dim, out_dim), s_out),
    }
    return {
        "gates": gates,
        "scorer": _uniform(ks[9], (in_dim, 1), s_in),
        "gcn_init": _uniform(ks[10], (in_dim, out_dim), s_out),
    }


def make_evolve_gcn_params(key, input_dim, hidden_dim, output_dim):
    k1, k2 = jax.random.split(key)
    return {"layers": [make_grcu_params(k1, input_dim, hidden_dim),
                       make_grcu_params(k2, hidden_dim, output_dim)]}


# ----------------------------------------------------------------------------
if __name__ == "__main__":
    key = jax.random.PRNGKey(0)
    N, input_dim, hidden_dim, output_dim, duration = 16, 8, 16, 8, 3
    # (top-k needs hidden_dim <= N and output_dim <= N)

    kp, ka, kx = jax.random.split(key, 3)
    params = make_evolve_gcn_params(kp, input_dim, hidden_dim, output_dim)

    A = jax.random.uniform(ka, (duration, N, N), F32)
    A = 0.5 * (A + jnp.swapaxes(A, 1, 2))
    A_stack = A / jnp.sum(A, axis=2, keepdims=True)   # row-normalized Ahat_t, [T, N, N]
    X_stack = jax.random.normal(kx, (duration, N, input_dim), F32)  # [T, N, Din]

    fwd = jax.jit(evolve_gcn_forward)
    out = fwd(params, A_stack, X_stack)
    jax.block_until_ready(out)
    assert out.shape == (duration, N, output_dim)
    assert bool(jnp.all(jnp.isfinite(out)))
    print("KERNEL_OK")
</pallas_src>

<mosaic_0001>
module attributes {stable_mosaic.version = 11 : i64} {
  func.func @_score_kernel(%arg0: i32, %arg1: memref<3x16x128xf32, #tpu.memory_space<vmem>>, %arg2: memref<1x128xf32, #tpu.memory_space<vmem>>, %arg3: memref<3x1x16xf32, #tpu.memory_space<vmem>>) attributes {dimension_semantics = [#tpu.dimension_semantics<parallel>], iteration_bounds = array<i64: 1>, scalar_prefetch = 0 : i64, scratch_operands = 0 : i64, tpu.core_type = #tpu.core_type<tc>, window_params = [{transform_indices = @transform_0, window_bounds = array<i64: 3, 16, 128>}, {pipeline_mode = #tpu.pipeline_mode<synchronous>, transform_indices = @transform_1, window_bounds = array<i64: 1, 128>}, {transform_indices = @transform_2, window_bounds = array<i64: 3, 1, 16>}]} {
    %c0 = arith.constant 0 : index
    %c0_0 = arith.constant 0 : index
    %c0_1 = arith.constant 0 : index
    %0 = vector.load %arg1[%c0, %c0_0, %c0_1] : memref<3x16x128xf32, #tpu.memory_space<vmem>>, vector<3x16x128xf32>
    %c0_2 = arith.constant 0 : index
    %c0_3 = arith.constant 0 : index
    %1 = vector.load %arg2[%c0_2, %c0_3] : memref<1x128xf32, #tpu.memory_space<vmem>>, vector<1x128xf32>
    %2 = vector.shape_cast %1 : vector<1x128xf32> to vector<1x1x128xf32>
    %3 = vector.broadcast %2 : vector<1x1x128xf32> to vector<3x16x128xf32>
    %4 = arith.mulf %0, %3 : vector<3x16x128xf32>
    %cst = arith.constant dense<0.000000e+00> : vector<3x16xf32>
    %5 = vector.multi_reduction <add>, %4, %cst [2] : vector<3x16x128xf32> to vector<3x16xf32>
    %6 = vector.shape_cast %5 : vector<3x16xf32> to vector<3x1x16xf32>
    %c0_4 = arith.constant 0 : index
    %c0_5 = arith.constant 0 : index
    %c0_6 = arith.constant 0 : index
    %7 = vector.load %arg3[%c0_4, %c0_5, %c0_6] : memref<3x1x16xf32, #tpu.memory_space<vmem>>, vector<3x1x16xf32>
    tpu.vector_store %arg3[%c0_4, %c0_5, %c0_6], %6 {strides = array<i32>} : memref<3x1x16xf32, #tpu.memory_space<vmem>>, vector<3x1x16xf32>,
    return
  }
  func.func @transform_0(%arg0: i32) -> (i32, i32, i32) {
    %c0_i32 = arith.constant 0 : i32
    %c0_i32_0 = arith.constant 0 : i32
    %c0_i32_1 = arith.constant 0 : i32
    return %arg0, %c0_i32, %c0_i32_0 : i32, i32, i32
  }
  func.func @transform_1(%arg0: i32) -> (i32, i32) {
    %c0_i32 = arith.constant 0 : i32
    %c0_i32_0 = arith.constant 0 : i32
    %c0_i32_1 = arith.constant 0 : i32
    return %c0_i32, %c0_i32_0 : i32, i32
  }
  func.func @transform_2(%arg0: i32) -> (i32, i32, i32) {
    %c0_i32 = arith.constant 0 : i32
    %c0_i32_0 = arith.constant 0 : i32
    %c0_i32_1 = arith.constant 0 : i32
    return %arg0, %c0_i32, %c0_i32_0 : i32, i32, i32
  }
}

module attributes {stable_mosaic.version = 11 : i64} {
  func.func @_evolve_kernel(%arg0: i32, %arg1: memref<1x128x128xbf16, #tpu.memory_space<vmem>>, %arg2: memref<128x128xf32, #tpu.memory_space<vmem>>, %arg3: memref<256x256xbf16, #tpu.memory_space<vmem>>, %arg4: memref<256x128xf32, #tpu.memory_space<vmem>>, %arg5: memref<128x256xbf16, #tpu.memory_space<vmem>>, %arg6: memref<128x128xf32, #tpu.memory_space<vmem>>, %arg7: memref<1x128x128xbf16, #tpu.memory_space<vmem>>, %arg8: memref<128x128xf32, #tpu.memory_space<vmem>>, %arg9: memref<256x128xbf16, #tpu.memory_space<vmem>>) attributes {dimension_semantics = [#tpu.dimension_semantics<arbitrary>], iteration_bounds = array<i64: 3>, scalar_prefetch = 0 : i64, scratch_operands = 2 : i64, tpu.core_type = #tpu.core_type<tc>, window_params = [{transform_indices = @transform_0, window_bounds = array<i64: 1, 128, 128>}, {pipeline_mode = #tpu.pipeline_mode<synchronous>, transform_indices = @transform_1, window_bounds = array<i64: 128, 128>}, {pipeline_mode = #tpu.pipeline_mode<synchronous>, transform_indices = @transform_2, window_bounds = array<i64: 256, 256>}, {pipeline_mode = #tpu.pipeline_mode<synchronous>, transform_indices = @transform_3, window_bounds = array<i64: 256, 128>}, {pipeline_mode = #tpu.pipeline_mode<synchronous>, transform_indices = @transform_4, window_bounds = array<i64: 128, 256>}, {pipeline_mode = #tpu.pipeline_mode<synchronous>, transform_indices = @transform_5, window_bounds = array<i64: 128, 128>}, {transform_indices = @transform_6, window_bounds = array<i64: 1, 128, 128>}]} {
    %c0_i32 = arith.constant 0 : i32
    %0 = arith.cmpi eq, %arg0, %c0_i32 : i32
    %1 = arith.extui %0 : i1 to i32
    %c0_i32_0 = arith.constant 0 : i32
    %2 = arith.cmpi ne, %1, %c0_i32_0 : i32
    scf.if %2 {
      %c0_30 = arith.constant 0 : index
      %c0_31 = arith.constant 0 : index
      %40 = vector.load %arg2[%c0_30, %c0_31] : memref<128x128xf32, #tpu.memory_space<vmem>>, vector<128x128xf32>
      %c0_32 = arith.constant 0 : index
      %c0_33 = arith.constant 0 : index
      %41 = vector.load %arg8[%c0_32, %c0_33] : memref<128x128xf32, #tpu.memory_space<vmem>>, vector<128x128xf32>
      tpu.vector_store %arg8[%c0_32, %c0_33], %40 {strides = array<i32>} : memref<128x128xf32, #tpu.memory_space<vmem>>, vector<128x128xf32>,
    } else {
    }
    %c0 = arith.constant 0 : index
    %c0_1 = arith.constant 0 : index
    %3 = vector.load %arg8[%c0, %c0_1] : memref<128x128xf32, #tpu.memory_space<vmem>>, vector<128x128xf32>
    %c0_2 = arith.constant 0 : index
    %c0_3 = arith.constant 0 : index
    %c0_4 = arith.constant 0 : index
    %4 = vector.load %arg1[%c0_2, %c0_3, %c0_4] : memref<1x128x128xbf16, #tpu.memory_space<vmem>>, vector<1x128x128xbf16>
    %5 = vector.shape_cast %4 : vector<1x128x128xbf16> to vector<128x128xbf16>
    %c0_5 = arith.constant 0 : index
    %c0_6 = arith.constant 0 : index
    %6 = vector.load %arg9[%c0_5, %c0_6] : memref<256x128xbf16, #tpu.memory_space<vmem>>, vector<128x128xbf16>
    tpu.vector_store %arg9[%c0_5, %c0_6], %5 {strides = array<i32>} : memref<256x128xbf16, #tpu.memory_space<vmem>>, vector<128x128xbf16>,
    %7 = arith.truncf %3 : vector<128x128xf32> to vector<128x128xbf16>
    %c128 = arith.constant 128 : index
    %c0_7 = arith.constant 0 : index
    %8 = vector.load %arg9[%c128, %c0_7] : memref<256x128xbf16, #tpu.memory_space<vmem>>, vector<128x128xbf16>
    tpu.vector_store %arg9[%c128, %c0_7], %7 {strides = array<i32>} : memref<256x128xbf16, #tpu.memory_space<vmem>>, vector<128x128xbf16>,
    %c0_8 = arith.constant 0 : index
    %c0_9 = arith.constant 0 : index
    %9 = vector.load %arg3[%c0_8, %c0_9] : memref<256x256xbf16, #tpu.memory_space<vmem>>, vector<256x256xbf16>
    %c0_10 = arith.constant 0 : index
    %c0_11 = arith.constant 0 : index
    %10 = vector.load %arg9[%c0_10, %c0_11] : memref<256x128xbf16, #tpu.memory_space<vmem>>, vector<256x128xbf16>
    %cst = arith.constant dense<0.000000e+00> : vector<256x128xf32>
    %11 = tpu.matmul %9, %10, %cst {dimension_numbers = #tpu.dot_dimension_numbers<[1], [0], [0], [1], [0, 0, 1, 1], [], []>} : vector<256x256xbf16>, vector<256x128xbf16>, vector<256x128xf32> -> vector<256x128xf32>
    %c0_12 = arith.constant 0 : index
    %c0_13 = arith.constant 0 : index
    %12 = vector.load %arg4[%c0_12, %c0_13] : memref<256x128xf32, #tpu.memory_space<vmem>>, vector<256x128xf32>
    %13 = arith.addf %11, %12 : vector<256x128xf32>
    %14 = arith.negf %13 : vector<256x128xf32>
    %15 = math.exp %14 : vector<256x128xf32>
    %cst_14 = arith.constant 1.000000e+00 : f32
    %16 = vector.broadcast %cst_14 : f32 to vector<256x128xf32>
    %17 = arith.addf %16, %15 : vector<256x128xf32>
    %18 = arith.divf %16, %17 : vector<256x128xf32>
    %19 = vector.extract_strided_slice %18 {offsets = [0, 0], sizes = [128, 128], strides = [1, 1]} : vector<256x128xf32> to vector<128x128xf32>
    %20 = vector.extract_strided_slice %18 {offsets = [128, 0], sizes = [128, 128], strides = [1, 1]} : vector<256x128xf32> to vector<128x128xf32>
    %21 = arith.mulf %20, %3 : vector<128x128xf32>
    %22 = arith.truncf %21 : vector<128x128xf32> to vector<128x128xbf16>
    %c128_15 = arith.constant 128 : index
    %c0_16 = arith.constant 0 : index
    %23 = vector.load %arg9[%c128_15, %c0_16] : memref<256x128xbf16, #tpu.memory_space<vmem>>, vector<128x128xbf16>
    tpu.vector_store %arg9[%c128_15, %c0_16], %22 {strides = array<i32>} : memref<256x128xbf16, #tpu.memory_space<vmem>>, vector<128x128xbf16>,
    %c0_17 = arith.constant 0 : index
    %c0_18 = arith.constant 0 : index
    %24 = vector.load %arg5[%c0_17, %c0_18] : memref<128x256xbf16, #tpu.memory_space<vmem>>, vector<128x256xbf16>
    %c0_19 = arith.constant 0 : index
    %c0_20 = arith.constant 0 : index
    %25 = vector.load %arg9[%c0_19, %c0_20] : memref<256x128xbf16, #tpu.memory_space<vmem>>, vector<256x128xbf16>
    %cst_21 = arith.constant dense<0.000000e+00> : vector<128x128xf32>
    %26 = tpu.matmul %24, %25, %cst_21 {dimension_numbers = #tpu.dot_dimension_numbers<[1], [0], [0], [1], [0, 0, 1, 1], [], []>} : vector<128x256xbf16>, vector<256x128xbf16>, vector<128x128xf32> -> vector<128x128xf32>
    %c0_22 = arith.constant 0 : index
    %c0_23 = arith.constant 0 : index
    %27 = vector.load %arg6[%c0_22, %c0_23] : memref<128x128xf32, #tpu.memory_space<vmem>>, vector<128x128xf32>
    %28 = arith.addf %26, %27 : vector<128x128xf32>
    %29 = math.tanh %28 : vector<128x128xf32>
    %cst_24 = arith.constant 1.000000e+00 : f32
    %30 = vector.broadcast %cst_24 : f32 to vector<128x128xf32>
    %31 = arith.subf %30, %19 : vector<128x128xf32>
    %32 = arith.mulf %31, %3 : vector<128x128xf32>
    %33 = arith.mulf %19, %29 : vector<128x128xf32>
    %34 = arith.addf %32, %33 : vector<128x128xf32>
    %c0_25 = arith.constant 0 : index
    %c0_26 = arith.constant 0 : index
    %35 = vector.load %arg8[%c0_25, %c0_26] : memref<128x128xf32, #tpu.memory_space<vmem>>, vector<128x128xf32>
    tpu.vector_store %arg8[%c0_25, %c0_26], %34 {strides = array<i32>} : memref<128x128xf32, #tpu.memory_space<vmem>>, vector<128x128xf32>,
    %36 = arith.truncf %34 : vector<128x128xf32> to vector<128x128xbf16>
    %c0_27 = arith.constant 0 : index
    %c0_28 = arith.constant 0 : index
    %c0_29 = arith.constant 0 : index
    %37 = vector.load %arg7[%c0_27, %c0_28, %c0_29] : memref<1x128x128xbf16, #tpu.memory_space<vmem>>, vector<1x128x128xbf16>
    %38 = vector.shape_cast %37 : vector<1x128x128xbf16> to vector<128x128xbf16>
    %39 = vector.shape_cast %36 : vector<128x128xbf16> to vector<1x128x128xbf16>
    tpu.vector_store %arg7[%c0_27, %c0_28, %c0_29], %39 {strides = array<i32>} : memref<1x128x128xbf16, #tpu.memory_space<vmem>>, vector<1x128x128xbf16>,
    return
  }
  func.func @transform_0(%arg0: i32) -> (i32, i32, i32) {
    %c0_i32 = arith.constant 0 : i32
    %c0_i32_0 = arith.constant 0 : i32
    %c0_i32_1 = arith.constant 0 : i32
    return %arg0, %c0_i32, %c0_i32_0 : i32, i32, i32
  }
  func.func @transform_1(%arg0: i32) -> (i32, i32) {
    %c0_i32 = arith.constant 0 : i32
    %c0_i32_0 = arith.constant 0 : i32
    %c0_i32_1 = arith.constant 0 : i32
    return %c0_i32, %c0_i32_0 : i32, i32
  }
  func.func @transform_2(%arg0: i32) -> (i32, i32) {
    %c0_i32 = arith.constant 0 : i32
    %c0_i32_0 = arith.constant 0 : i32
    %c0_i32_1 = arith.constant 0 : i32
    return %c0_i32, %c0_i32_0 : i32, i32
  }
  func.func @transform_3(%arg0: i32) -> (i32, i32) {
    %c0_i32 = arith.constant 0 : i32
    %c0_i32_0 = arith.constant 0 : i32
    %c0_i32_1 = arith.constant 0 : i32
    return %c0_i32, %c0_i32_0 : i32, i32
  }
  func.func @transform_4(%arg0: i32) -> (i32, i32) {
    %c0_i32 = arith.constant 0 : i32
    %c0_i32_0 = arith.constant 0 : i32
    %c0_i32_1 = arith.constant 0 : i32
    return %c0_i32, %c0_i32_0 : i32, i32
  }
  func.func @transform_5(%arg0: i32) -> (i32, i32) {
    %c0_i32 = arith.constant 0 : i32
    %c0_i32_0 = arith.constant 0 : i32
    %c0_i32_1 = arith.constant 0 : i32
    return %c0_i32, %c0_i32_0 : i32, i32
  }
  func.func @transform_6(%arg0: i32) -> (i32, i32, i32) {
    %c0_i32 = arith.constant 0 : i32
    %c0_i32_0 = arith.constant 0 : i32
    %c0_i32_1 = arith.constant 0 : i32
    return %arg0, %c0_i32, %c0_i32_0 : i32, i32, i32
  }
}

module attributes {stable_mosaic.version = 11 : i64} {
  func.func @_gcn_kernel(%arg0: i32, %arg1: i32, %arg2: i32, %arg3: memref<1x16x16xf32, #tpu.memory_space<vmem>>, %arg4: memref<1x16x128xf32, #tpu.memory_space<vmem>>, %arg5: memref<1x128x128xbf16, #tpu.memory_space<vmem>>, %arg6: memref<1x16x128xbf16, #tpu.memory_space<vmem>>, %arg7: memref<16x128xf32, #tpu.memory_space<vmem>>) attributes {dimension_semantics = [#tpu.dimension_semantics<parallel>, #tpu.dimension_semantics<parallel>, #tpu.dimension_semantics<arbitrary>], iteration_bounds = array<i64: 3, 1, 1>, scalar_prefetch = 0 : i64, scratch_operands = 1 : i64, tpu.core_type = #tpu.core_type<tc>, window_params = [{transform_indices = @transform_0, window_bounds = array<i64: 1, 16, 16>}, {transform_indices = @transform_1, window_bounds = array<i64: 1, 16, 128>}, {transform_indices = @transform_2, window_bounds = array<i64: 1, 128, 128>}, {transform_indices = @transform_3, window_bounds = array<i64: 1, 16, 128>}]} {
    %c0_i32 = arith.constant 0 : i32
    %0 = arith.cmpi eq, %arg2, %c0_i32 : i32
    %1 = arith.extui %0 : i1 to i32
    %c0_i32_0 = arith.constant 0 : i32
    %2 = arith.cmpi ne, %1, %c0_i32_0 : i32
    scf.if %2 {
      %cst_12 = arith.constant 0.000000e+00 : f32
      %16 = vector.broadcast %cst_12 : f32 to vector<16x128xf32>
      %c0_13 = arith.constant 0 : index
      %c0_14 = arith.constant 0 : index
      %17 = vector.load %arg7[%c0_13, %c0_14] : memref<16x128xf32, #tpu.memory_space<vmem>>, vector<16x128xf32>
      tpu.vector_store %arg7[%c0_13, %c0_14], %16 {strides = array<i32>} : memref<16x128xf32, #tpu.memory_space<vmem>>, vector<16x128xf32>,
    } else {
    }
    %c0 = arith.constant 0 : index
    %c0_1 = arith.constant 0 : index
    %c0_2 = arith.constant 0 : index
    %3 = vector.load %arg3[%c0, %c0_1, %c0_2] : memref<1x16x16xf32, #tpu.memory_space<vmem>>, vector<1x16x16xf32>
    %4 = vector.shape_cast %3 : vector<1x16x16xf32> to vector<16x16xf32>
    %5 = arith.truncf %4 : vector<16x16xf32> to vector<16x16xbf16>
    %c0_3 = arith.constant 0 : index
    %c0_4 = arith.constant 0 : index
    %c0_5 = arith.constant 0 : index
    %6 = vector.load %arg4[%c0_3, %c0_4, %c0_5] : memref<1x16x128xf32, #tpu.memory_space<vmem>>, vector<1x16x128xf32>
    %7 = vector.shape_cast %6 : vector<1x16x128xf32> to vector<16x128xf32>
    %8 = arith.truncf %7 : vector<16x128xf32> to vector<16x128xbf16>
    %c0_6 = arith.constant 0 : index
    %c0_7 = arith.constant 0 : index
    %9 = vector.load %arg7[%c0_6, %c0_7] : memref<16x128xf32, #tpu.memory_space<vmem>>, vector<16x128xf32>
    %cst = arith.constant dense<0.000000e+00> : vector<16x128xf32>
    %10 = tpu.matmul %5, %8, %cst {dimension_numbers = #tpu.dot_dimension_numbers<[1], [0], [0], [1], [0, 0, 1, 1], [], []>} : vector<16x16xbf16>, vector<16x128xbf16>, vector<16x128xf32> -> vector<16x128xf32>
    %11 = arith.addf %9, %10 : vector<16x128xf32>
    %c0_8 = arith.constant 0 : index
    %c0_9 = arith.constant 0 : index
    %12 = vector.load %arg7[%c0_8, %c0_9] : memref<16x128xf32, #tpu.memory_space<vmem>>, vector<16x128xf32>
    tpu.vector_store %arg7[%c0_8, %c0_9], %11 {strides = array<i32>} : memref<16x128xf32, #tpu.memory_space<vmem>>, vector<16x128xf32>,
    %c0_i32_10 = arith.constant 0 : i32
    %13 = arith.cmpi eq, %arg2, %c0_i32_10 : i32
    %14 = arith.extui %13 : i1 to i32
    %c0_i32_11 = arith.constant 0 : i32
    %15 = arith.cmpi ne, %14, %c0_i32_11 : i32
    scf.if %15 {
      %c0_12 = arith.constant 0 : index
      %c0_13 = arith.constant 0 : index
      %16 = vector.load %arg7[%c0_12, %c0_13] : memref<16x128xf32, #tpu.memory_space<vmem>>, vector<16x128xf32>
      %17 = arith.truncf %16 : vector<16x128xf32> to vector<16x128xbf16>
      %c0_14 = arith.constant 0 : index
      %c0_15 = arith.constant 0 : index
      %c0_16 = arith.constant 0 : index
      %18 = vector.load %arg5[%c0_14, %c0_15, %c0_16] : memref<1x128x128xbf16, #tpu.memory_space<vmem>>, vector<1x128x128xbf16>
      %19 = vector.shape_cast %18 : vector<1x128x128xbf16> to vector<128x128xbf16>
      %cst_17 = arith.constant dense<0.000000e+00> : vector<16x128xf32>
      %20 = tpu.matmul %17, %19, %cst_17 {dimension_numbers = #tpu.dot_dimension_numbers<[1], [0], [0], [1], [0, 0, 1, 1], [], []>} : vector<16x128xbf16>, vector<128x128xbf16>, vector<16x128xf32> -> vector<16x128xf32>
      %cst_18 = arith.constant 0.000000e+00 : f32
      %21 = vector.broadcast %cst_18 : f32 to vector<16x128xf32>
      %22 = arith.cmpf oge, %20, %21 : vector<16x128xf32>
      %cst_19 = arith.constant 0.229166672 : f32
      %23 = vector.broadcast %cst_19 : f32 to vector<16x128xf32>
      %24 = arith.mulf %20, %23 : vector<16x128xf32>
      %25 = arith.select %22, %20, %24 : vector<16x128xi1>, vector<16x128xf32>
      %26 = arith.truncf %25 : vector<16x128xf32> to vector<16x128xbf16>
      %c0_20 = arith.constant 0 : index
      %c0_21 = arith.constant 0 : index
      %c0_22 = arith.constant 0 : index
      %27 = vector.load %arg6[%c0_20, %c0_21, %c0_22] : memref<1x16x128xbf16, #tpu.memory_space<vmem>>, vector<1x16x128xbf16>
      %28 = vector.shape_cast %27 : vector<1x16x128xbf16> to vector<16x128xbf16>
      %29 = vector.shape_cast %26 : vector<16x128xbf16> to vector<1x16x128xbf16>
      tpu.vector_store %arg6[%c0_20, %c0_21, %c0_22], %29 {strides = array<i32>} : memref<1x16x128xbf16, #tpu.memory_space<vmem>>, vector<1x16x128xbf16>,
    } else {
    }
    return
  }
  func.func @transform_0(%arg0: i32, %arg1: i32, %arg2: i32) -> (i32, i32, i32) {
    %c0_i32 = arith.constant 0 : i32
    return %arg0, %arg1, %arg2 : i32, i32, i32
  }
  func.func @transform_1(%arg0: i32, %arg1: i32, %arg2: i32) -> (i32, i32, i32) {
    %c0_i32 = arith.constant 0 : i32
    %c0_i32_0 = arith.constant 0 : i32
    return %arg0, %arg2, %c0_i32 : i32, i32, i32
  }
  func.func @transform_2(%arg0: i32, %arg1: i32, %arg2: i32) -> (i32, i32, i32) {
    %c0_i32 = arith.constant 0 : i32
    %c0_i32_0 = arith.constant 0 : i32
    %c0_i32_1 = arith.constant 0 : i32
    return %arg0, %c0_i32, %c0_i32_0 : i32, i32, i32
  }
  func.func @transform_3(%arg0: i32, %arg1: i32, %arg2: i32) -> (i32, i32, i32) {
    %c0_i32 = arith.constant 0 : i32
    %c0_i32_0 = arith.constant 0 : i32
    return %arg0, %arg1, %c0_i32 : i32, i32, i32
  }
}

module attributes {stable_mosaic.version = 11 : i64} {
  func.func @_score_kernel(%arg0: i32, %arg1: memref<3x16x128xbf16, #tpu.memory_space<vmem>>, %arg2: memref<1x128xf32, #tpu.memory_space<vmem>>, %arg3: memref<3x1x16xf32, #tpu.memory_space<vmem>>) attributes {dimension_semantics = [#tpu.dimension_semantics<parallel>], iteration_bounds = array<i64: 1>, scalar_prefetch = 0 : i64, scratch_operands = 0 : i64, tpu.core_type = #tpu.core_type<tc>, window_params = [{transform_indices = @transform_0, window_bounds = array<i64: 3, 16, 128>}, {pipeline_mode = #tpu.pipeline_mode<synchronous>, transform_indices = @transform_1, window_bounds = array<i64: 1, 128>}, {transform_indices = @transform_2, window_bounds = array<i64: 3, 1, 16>}]} {
    %c0 = arith.constant 0 : index
    %c0_0 = arith.constant 0 : index
    %c0_1 = arith.constant 0 : index
    %0 = vector.load %arg1[%c0, %c0_0, %c0_1] : memref<3x16x128xbf16, #tpu.memory_space<vmem>>, vector<3x16x128xbf16>
    %1 = arith.extf %0 : vector<3x16x128xbf16> to vector<3x16x128xf32>
    %c0_2 = arith.constant 0 : index
    %c0_3 = arith.constant 0 : index
    %2 = vector.load %arg2[%c0_2, %c0_3] : memref<1x128xf32, #tpu.memory_space<vmem>>, vector<1x128xf32>
    %3 = vector.shape_cast %2 : vector<1x128xf32> to vector<1x1x128xf32>
    %4 = vector.broadcast %3 : vector<1x1x128xf32> to vector<3x16x128xf32>
    %5 = arith.mulf %1, %4 : vector<3x16x128xf32>
    %cst = arith.constant dense<0.000000e+00> : vector<3x16xf32>
    %6 = vector.multi_reduction <add>, %5, %cst [2] : vector<3x16x128xf32> to vector<3x16xf32>
    %7 = vector.shape_cast %6 : vector<3x16xf32> to vector<3x1x16xf32>
    %c0_4 = arith.constant 0 : index
    %c0_5 = arith.constant 0 : index
    %c0_6 = arith.constant 0 : index
    %8 = vector.load %arg3[%c0_4, %c0_5, %c0_6] : memref<3x1x16xf32, #tpu.memory_space<vmem>>, vector<3x1x16xf32>
    tpu.vector_store %arg3[%c0_4, %c0_5, %c0_6], %7 {strides = array<i32>} : memref<3x1x16xf32, #tpu.memory_space<vmem>>, vector<3x1x16xf32>,
    return
  }
  func.func @transform_0(%arg0: i32) -> (i32, i32, i32) {
    %c0_i32 = arith.constant 0 : i32
    %c0_i32_0 = arith.constant 0 : i32
    %c0_i32_1 = arith.constant 0 : i32
    return %arg0, %c0_i32, %c0_i32_0 : i32, i32, i32
  }
  func.func @transform_1(%arg0: i32) -> (i32, i32) {
    %c0_i32 = arith.constant 0 : i32
    %c0_i32_0 = arith.constant 0 : i32
    %c0_i32_1 = arith.constant 0 : i32
    return %c0_i32, %c0_i32_0 : i32, i32
  }
  func.func @transform_2(%arg0: i32) -> (i32, i32, i32) {
    %c0_i32 = arith.constant 0 : i32
    %c0_i32_0 = arith.constant 0 : i32
    %c0_i32_1 = arith.constant 0 : i32
    return %arg0, %c0_i32, %c0_i32_0 : i32, i32, i32
  }
}

module attributes {stable_mosaic.version = 11 : i64} {
  func.func @_gcn_kernel(%arg0: i32, %arg1: i32, %arg2: i32, %arg3: memref<1x16x16xf32, #tpu.memory_space<vmem>>, %arg4: memref<1x16x128xbf16, #tpu.memory_space<vmem>>, %arg5: memref<1x128x128xbf16, #tpu.memory_space<vmem>>, %arg6: memref<1x16x128xf32, #tpu.memory_space<vmem>>, %arg7: memref<16x128xf32, #tpu.memory_space<vmem>>) attributes {dimension_semantics = [#tpu.dimension_semantics<parallel>, #tpu.dimension_semantics<parallel>, #tpu.dimension_semantics<arbitrary>], iteration_bounds = array<i64: 3, 1, 1>, scalar_prefetch = 0 : i64, scratch_operands = 1 : i64, tpu.core_type = #tpu.core_type<tc>, window_params = [{transform_indices = @transform_0, window_bounds = array<i64: 1, 16, 16>}, {transform_indices = @transform_1, window_bounds = array<i64: 1, 16, 128>}, {transform_indices = @transform_2, window_bounds = array<i64: 1, 128, 128>}, {transform_indices = @transform_3, window_bounds = array<i64: 1, 16, 128>}]} {
    %c0_i32 = arith.constant 0 : i32
    %0 = arith.cmpi eq, %arg2, %c0_i32 : i32
    %1 = arith.extui %0 : i1 to i32
    %c0_i32_0 = arith.constant 0 : i32
    %2 = arith.cmpi ne, %1, %c0_i32_0 : i32
    scf.if %2 {
      %cst_12 = arith.constant 0.000000e+00 : f32
      %15 = vector.broadcast %cst_12 : f32 to vector<16x128xf32>
      %c0_13 = arith.constant 0 : index
      %c0_14 = arith.constant 0 : index
      %16 = vector.load %arg7[%c0_13, %c0_14] : memref<16x128xf32, #tpu.memory_space<vmem>>, vector<16x128xf32>
      tpu.vector_store %arg7[%c0_13, %c0_14], %15 {strides = array<i32>} : memref<16x128xf32, #tpu.memory_space<vmem>>, vector<16x128xf32>,
    } else {
    }
    %c0 = arith.constant 0 : index
    %c0_1 = arith.constant 0 : index
    %c0_2 = arith.constant 0 : index
    %3 = vector.load %arg3[%c0, %c0_1, %c0_2] : memref<1x16x16xf32, #tpu.memory_space<vmem>>, vector<1x16x16xf32>
    %4 = vector.shape_cast %3 : vector<1x16x16xf32> to vector<16x16xf32>
    %5 = arith.truncf %4 : vector<16x16xf32> to vector<16x16xbf16>
    %c0_3 = arith.constant 0 : index
    %c0_4 = arith.constant 0 : index
    %c0_5 = arith.constant 0 : index
    %6 = vector.load %arg4[%c0_3, %c0_4, %c0_5] : memref<1x16x128xbf16, #tpu.memory_space<vmem>>, vector<1x16x128xbf16>
    %7 = vector.shape_cast %6 : vector<1x16x128xbf16> to vector<16x128xbf16>
    %c0_6 = arith.constant 0 : index
    %c0_7 = arith.constant 0 : index
    %8 = vector.load %arg7[%c0_6, %c0_7] : memref<16x128xf32, #tpu.memory_space<vmem>>, vector<16x128xf32>
    %cst = arith.constant dense<0.000000e+00> : vector<16x128xf32>
    %9 = tpu.matmul %5, %7, %cst {dimension_numbers = #tpu.dot_dimension_numbers<[1], [0], [0], [1], [0, 0, 1, 1], [], []>} : vector<16x16xbf16>, vector<16x128xbf16>, vector<16x128xf32> -> vector<16x128xf32>
    %10 = arith.addf %8, %9 : vector<16x128xf32>
    %c0_8 = arith.constant 0 : index
    %c0_9 = arith.constant 0 : index
    %11 = vector.load %arg7[%c0_8, %c0_9] : memref<16x128xf32, #tpu.memory_space<vmem>>, vector<16x128xf32>
    tpu.vector_store %arg7[%c0_8, %c0_9], %10 {strides = array<i32>} : memref<16x128xf32, #tpu.memory_space<vmem>>, vector<16x128xf32>,
    %c0_i32_10 = arith.constant 0 : i32
    %12 = arith.cmpi eq, %arg2, %c0_i32_10 : i32
    %13 = arith.extui %12 : i1 to i32
    %c0_i32_11 = arith.constant 0 : i32
    %14 = arith.cmpi ne, %13, %c0_i32_11 : i32
    scf.if %14 {
      %c0_12 = arith.constant 0 : index
      %c0_13 = arith.constant 0 : index
      %15 = vector.load %arg7[%c0_12, %c0_13] : memref<16x128xf32, #tpu.memory_space<vmem>>, vector<16x128xf32>
      %16 = arith.truncf %15 : vector<16x128xf32> to vector<16x128xbf16>
      %c0_14 = arith.constant 0 : index
      %c0_15 = arith.constant 0 : index
      %c0_16 = arith.constant 0 : index
      %17 = vector.load %arg5[%c0_14, %c0_15, %c0_16] : memref<1x128x128xbf16, #tpu.memory_space<vmem>>, vector<1x128x128xbf16>
      %18 = vector.shape_cast %17 : vector<1x128x128xbf16> to vector<128x128xbf16>
      %cst_17 = arith.constant dense<0.000000e+00> : vector<16x128xf32>
      %19 = tpu.matmul %16, %18, %cst_17 {dimension_numbers = #tpu.dot_dimension_numbers<[1], [0], [0], [1], [0, 0, 1, 1], [], []>} : vector<16x128xbf16>, vector<128x128xbf16>, vector<16x128xf32> -> vector<16x128xf32>
      %cst_18 = arith.constant 0.000000e+00 : f32
      %20 = vector.broadcast %cst_18 : f32 to vector<16x128xf32>
      %21 = arith.cmpf oge, %19, %20 : vector<16x128xf32>
      %cst_19 = arith.constant 0.229166672 : f32
      %22 = vector.broadcast %cst_19 : f32 to vector<16x128xf32>
      %23 = arith.mulf %19, %22 : vector<16x128xf32>
      %24 = arith.select %21, %19, %23 : vector<16x128xi1>, vector<16x128xf32>
      %c0_20 = arith.constant 0 : index
      %c0_21 = arith.constant 0 : index
      %c0_22 = arith.constant 0 : index
      %25 = vector.load %arg6[%c0_20, %c0_21, %c0_22] : memref<1x16x128xf32, #tpu.memory_space<vmem>>, vector<1x16x128xf32>
      %26 = vector.shape_cast %25 : vector<1x16x128xf32> to vector<16x128xf32>
      %27 = vector.shape_cast %24 : vector<16x128xf32> to vector<1x16x128xf32>
      tpu.vector_store %arg6[%c0_20, %c0_21, %c0_22], %27 {strides = array<i32>} : memref<1x16x128xf32, #tpu.memory_space<vmem>>, vector<1x16x128xf32>,
    } else {
    }
    return
  }
  func.func @transform_0(%arg0: i32, %arg1: i32, %arg2: i32) -> (i32, i32, i32) {
    %c0_i32 = arith.constant 0 : i32
    return %arg0, %arg1, %arg2 : i32, i32, i32
  }
  func.func @transform_1(%arg0: i32, %arg1: i32, %arg2: i32) -> (i32, i32, i32) {
    %c0_i32 = arith.constant 0 : i32
    %c0_i32_0 = arith.constant 0 : i32
    return %arg0, %arg2, %c0_i32 : i32, i32, i32
  }
  func.func @transform_2(%arg0: i32, %arg1: i32, %arg2: i32) -> (i32, i32, i32) {
    %c0_i32 = arith.constant 0 : i32
    %c0_i32_0 = arith.constant 0 : i32
    %c0_i32_1 = arith.constant 0 : i32
    return %arg0, %c0_i32, %c0_i32_0 : i32, i32, i32
  }
  func.func @transform_3(%arg0: i32, %arg1: i32, %arg2: i32) -> (i32, i32, i32) {
    %c0_i32 = arith.constant 0 : i32
    %c0_i32_0 = arith.constant 0 : i32
    return %arg0, %arg1, %c0_i32 : i32, i32, i32
  }
}

</mosaic_0001>

<bundles_post_ra>
// kernel: evolve_gcn_forward.6
= control target key start
LH: loop header
LB: loop body
LE: loop exit
PB: predicated region body
PF: predicated region fallthrough
CT: control target
= control target key end

     0   :  { %v48_v13 = vlaneseq  ;;  %vm59_vm0 = vcmask 130112   ;;  %vm82_vm1 = vcmask 122880   ;;  %s142_s0 = inlined_call_operand.vmem [shape: f32[3,16,128], index: 0, kind: input, shape index: {}]   ;;  %s143_s1 = inlined_call_operand.vmem [shape: f32[1,128], index: 1, kind: input, shape index: {}]   ;;  %s144_s2 = inlined_call_operand.vmem [shape: f32[3,1,16], index: 2, kind: output, shape index: {}]  }
   0x1   :  { %v13_v0 = vld [vmem:[%s142_s0 + $0x10] sm:$0xff]  ;;  %v90_v1 = vld [vmem:[%s143_s1] ss:$0 sm:$0xff]  ;;  %v14_v5 = vld [vmem:[%s142_s0 + $0x18] sm:$0xff] }
   0x2   :  { %v11_v2 = vld [vmem:[%s142_s0] sm:$0xff]  ;;  %v26_v3 = vmul.f32 %v90_v1, %v13_v0  ;;  %v12_v6 = vld [vmem:[%s142_s0 + $0x8] sm:$0xff]  ;;  %v27_v7 = vmul.f32 %v90_v1, %v14_v5  ;;  %v49_v14 = vand.u32 127, %v48_v13  ;;  %v51_v15 = vshrl.u32 %v48_v13, 7 }
   0x3   :  { %v24_v4 = vmul.f32 %v90_v1, %v11_v2  ;;  %v25_v8 = vmul.f32 %v90_v1, %v12_v6  ;;  %v16_v9 = vld [vmem:[%s142_s0 + $0x28] sm:$0xff]  ;;  %v15_v10 = vld [vmem:[%s142_s0 + $0x20] sm:$0xff] }
   0x4   :  { %34 = vadd.xlane.f32.xlu1 %v26_v3  ;;  %v29_v11 = vmul.f32 %v90_v1, %v16_v9  ;;  %v28_v12 = vmul.f32 %v90_v1, %v15_v10  ;;  %v54_v16 = vadd.s32 4294967288, %v49_v14  ;;  %v52_v19 = vsub.s32 %v49_v14, %v51_v15 }
   0x5   :  { %30 = vadd.xlane.f32.xlu0 %v24_v4 }
   0x6   :  { %v57_v20 = vsub.s32 %v54_v16, %v51_v15 }
   0x8   :  { %36 = vadd.xlane.f32.xlu1 %v27_v7 }
   0x9   :  { %32 = vadd.xlane.f32.xlu0 %v25_v8 }
   0xc   :  { %40 = vadd.xlane.f32.xlu1 %v29_v11 }
   0xd   :  { %38 = vadd.xlane.f32.xlu0 %v28_v12 }
  0x91   :  { %v35_v17 = vpop.xlane.xlu1 %34 }
  0x92   :  { %v31_v18 = vpop.xlane.xlu0 %30  ;;  %v64_v23 = vrot.slane %v35_v17, %v52_v19 }
  0x93   :  { %v53_v24 = vrot.slane %v31_v18, %v52_v19 }
  0x95   :  { %v37_v21 = vpop.xlane.xlu1 %36 }
  0x96   :  { %v33_v22 = vpop.xlane.xlu0 %32  ;;  %v68_v25 = vrot.slane %v37_v21, %v57_v20 }
  0x97   :  { %v58_v26 = vrot.slane %v33_v22, %v57_v20 }
  0x98   :  { %v69_v27 = vsel %vm59_vm0, %v68_v25, %v64_v23 }
  0x99   :  { %v60_v28 = vsel %vm59_vm0, %v58_v26, %v53_v24  ;;  %84 = vst.msk [vmem:[%s144_s2 + $0x1] sm:$0x1] %vm82_vm1, %v69_v27  ;;  %v41_v29 = vpop.xlane.xlu1 %40 }
  0x9a   :  { %83 = vst.msk [vmem:[%s144_s2] sm:$0x1] %vm82_vm1, %v60_v28  ;;  %v39_v30 = vpop.xlane.xlu0 %38  ;;  %v77_v31 = vrot.slane %v41_v29, %v57_v20 }
  0x9b   :  { %v73_v32 = vrot.slane %v39_v30, %v52_v19 }
  0x9d   :  { %v78_v33 = vsel %vm59_vm0, %v77_v31, %v73_v32 }
  0x9e   :  { %85 = vst.msk [vmem:[%s144_s2 + $0x2] sm:$0x1] %vm82_vm1, %v78_v33 }

// kernel: evolve_gcn_forward.9
= control target key start
LH: loop header
LB: loop body
LE: loop exit
PB: predicated region body
PF: predicated region fallthrough
CT: control target
= control target key end

     0   :  { %v54_v16 = vlaneseq  ;;  %vm65_vm0 = vcmask 130112   ;;  %vm88_vm1 = vcmask 122880   ;;  %s153_s0 = inlined_call_operand.vmem [shape: bf16[3,16,128], index: 0, kind: input, shape index: {}]   ;;  %s154_s1 = inlined_call_operand.vmem [shape: f32[1,128], index: 1, kind: input, shape index: {}]   ;;  %s155_s2 = inlined_call_operand.vmem [shape: f32[3,1,16], index: 2, kind: output, shape index: {}]  }
   0x1   :  { %v109_v0 = vld [vmem:[%s153_s0 + $0x8] sm:$0xff]   ;;  %v96_v1 = vld [vmem:[%s154_s1] ss:$0 sm:$0xff]  ;;  %v110_v7 = vld [vmem:[%s153_s0 + $0x10] sm:$0xff]  }
   0x2   :  { %v98_v2 = vld [vmem:[%s153_s0] sm:$0xff]   ;;  %v103_v3 = vunpack.c.l.bf16 %v109_v0  ;;  %v104_v5 = vunpack.c.h.bf16 %v109_v0  ;;  %v108_v12 = vunpack.c.h.bf16 %v110_v7  ;;  %v107_v13 = vunpack.c.l.bf16 %v110_v7 }
   0x3   :  { %v99_v4 = vunpack.c.l.bf16 %v98_v2  ;;  %v100_v6 = vunpack.c.h.bf16 %v98_v2  ;;  %v55_v17 = vand.u32 127, %v54_v16  ;;  %v57_v18 = vshrl.u32 %v54_v16, 7 }
   0x4   :  { %v32_v8 = vmul.f32 %v103_v3, %v96_v1  ;;  %v33_v10 = vmul.f32 %v104_v5, %v96_v1  ;;  %v35_v14 = vmul.f32 %v108_v12, %v96_v1  ;;  %v34_v15 = vmul.f32 %v107_v13, %v96_v1 }
   0x5   :  { %v30_v9 = vmul.f32 %v99_v4, %v96_v1  ;;  %v31_v11 = vmul.f32 %v100_v6, %v96_v1  ;;  %v60_v19 = vadd.s32 4294967288, %v55_v17  ;;  %v58_v22 = vsub.s32 %v55_v17, %v57_v18 }
   0x6   :  { %40 = vadd.xlane.f32.xlu1 %v32_v8 }
   0x7   :  { %36 = vadd.xlane.f32.xlu0 %v30_v9  ;;  %v63_v23 = vsub.s32 %v60_v19, %v57_v18 }
   0xa   :  { %42 = vadd.xlane.f32.xlu1 %v33_v10 }
   0xb   :  { %38 = vadd.xlane.f32.xlu0 %v31_v11 }
   0xe   :  { %46 = vadd.xlane.f32.xlu1 %v35_v14 }
   0xf   :  { %44 = vadd.xlane.f32.xlu0 %v34_v15 }
  0x93   :  { %v41_v20 = vpop.xlane.xlu1 %40 }
  0x94   :  { %v37_v21 = vpop.xlane.xlu0 %36  ;;  %v70_v26 = vrot.slane %v41_v20, %v58_v22 }
  0x95   :  { %v59_v27 = vrot.slane %v37_v21, %v58_v22 }
  0x97   :  { %v43_v24 = vpop.xlane.xlu1 %42 }
  0x98   :  { %v39_v25 = vpop.xlane.xlu0 %38  ;;  %v74_v28 = vrot.slane %v43_v24, %v63_v23 }
  0x99   :  { %v64_v29 = vrot.slane %v39_v25, %v63_v23 }
  0x9a   :  { %v75_v30 = vsel %vm65_vm0, %v74_v28, %v70_v26 }
  0x9b   :  { %v66_v31 = vsel %vm65_vm0, %v64_v29, %v59_v27  ;;  %90 = vst.msk [vmem:[%s155_s2 + $0x1] sm:$0x1] %vm88_vm1, %v75_v30  ;;  %v47_v32 = vpop.xlane.xlu1 %46 }
  0x9c   :  { %89 = vst.msk [vmem:[%s155_s2] sm:$0x1] %vm88_vm1, %v66_v31  ;;  %v45_v33 = vpop.xlane.xlu0 %44  ;;  %v83_v34 = vrot.slane %v47_v32, %v63_v23 }
  0x9d   :  { %v79_v35 = vrot.slane %v45_v33, %v58_v22 }
  0x9f   :  { %v84_v36 = vsel %vm65_vm0, %v83_v34, %v79_v35 }
  0xa0   :  { %91 = vst.msk [vmem:[%s155_s2 + $0x2] sm:$0x1] %vm88_vm1, %v84_v36 }

// kernel: evolve_gcn_forward.8
= control target key start
LH: loop header
LB: loop body
LE: loop exit
PB: predicated region body
PF: predicated region fallthrough
CT: control target
= control target key end

     0   :  { %s752_s12 = smov 0   ;;  %s754_s13 = smov 0   ;;  %s806_s0 = inlined_call_operand.vmem [shape: f32[3,16,16], index: 0, kind: input, shape index: {}]   ;;  %s807_s1 = inlined_call_operand.vmem [shape: f32[3,16,128], index: 1, kind: input, shape index: {}]   ;;  %s808_s2 = inlined_call_operand.vmem [shape: bf16[3,128,128], index: 2, kind: input, shape index: {}]   ;;  %s809_s3 = inlined_call_operand.vmem [shape: bf16[3,16,128], index: 3, kind: output, shape index: {}]  }
   0x1   :  { %s756_s14 = smov 0  }
   0x2 LB: > { %s32_s15 = sadd.s32 1, %s724_s13  ;;  %p602_p0 = scmp.ge.s32.totalorder %s728_s14, 1  ;;  %s728_s14 = sphi %s756_s14, %s13_s14   ;;  %s724_s13 = sphi %s754_s13, %s811_s13   ;;  %s720_s12 = sphi %s752_s12, %s810_s12  }
   0x3   : > { %p34_p1 = scmp.ge.s32.totalorder %s32_s15, 3  ;;  %p197_p2 = scmp.lt.s32.totalorder %s728_s14, 4 }
   0x5   : > { %s813_s15 = smov (%p34_p1, %s32_s15), 0  ;;  %p198_p3 = pnand %p602_p0, %p197_p2 }
   0x6   : > { %p247_p4 = scmp.lt.s32.totalorder (!%p198_p3), %s720_s12, 2  ;;  %v730_v0 = vmov (!%p198_p3), 0.0   ;;  %vm731_vm0 = vmmov (!%p198_p3), 0   ;;  %vm299_vm1 = vcmask (!%p198_p3), 130048  }
   0x7   : > { %201 = sbr.rel (%p198_p3) target bundleno = 460 (0x1cc), region = 32  ;;  %646 = vmatprep.subr.bf16.mxu0 (!%p198_p3), %v730_v0  ;;  %648 = vmatprep.mubr.msk.bf16.mxu0 (!%p198_p3), %vm731_vm0, %v730_v0 }
   0x8   : > { %652 = vmatprep.subr.bf16.mxu1 (!%p198_p3), %v730_v0  ;;  %668 = vmatprep.mubr.msk.bf16.mxu1 (!%p198_p3), %vm731_vm0, %v730_v0 }
   0xe   : > { %s815_s12 = smov (!%p247_p4, %s720_s12), 2 }
   0xf   : > { %s624_s16 = sshll.u32 %s815_s12, 4  ;;  %s626_s17 = sshll.u32 %s815_s12, 6 }
  0x10   : > { %s257_s20 = scalar_lea.vmem %s806_s0, %s624_s16  ;;  %s267_s23 = scalar_lea.vmem %s807_s1, %s624_s16 }
  0x11   : > { %s783_s26 = scalar_lea.vmem %s808_s2, %s626_s17  ;;  %v291_v1 = vld [vmem:[%s257_s20] sm:$0xff]  ;;  %v292_v2 = vld [vmem:[%s257_s20 + $0x8] sm:$0xff]  ;;  %s627_s27 = sshll.u32 %s815_s12, 3 }
  0x12   : > { %v294_v3 = vld [vmem:[%s267_s23] sm:$0xff]  ;;  %v295_v4 = vld [vmem:[%s267_s23 + $0x8] sm:$0xff]  ;;  %v293_v7 = vpack.c.bf16 %v292_v2, %v291_v1  ;;  %v700_v9 = vld [vmem:[%s783_s26 + $0x10] sm:$0xff]   ;;  %s282_s30 = scalar_lea.vmem %s809_s3, %s627_s27 }
  0x13   : > { %v296_v5 = vpack.c.bf16 %v295_v4, %v294_v3  ;;  %v698_v6 = vld [vmem:[%s783_s26] sm:$0xff]   ;;  %v699_v8 = vld [vmem:[%s783_s26 + $0x8] sm:$0xff]   ;;  %v701_v10 = vld [vmem:[%s783_s26 + $0x18] sm:$0xff]  }
  0x14   : > { %653 = vmatpush3.bf16.msra.mxu1 %v698_v6  ;;  %v702_v11 = vld [vmem:[%s783_s26 + $0x20] sm:$0xff]   ;;  %v703_v12 = vld [vmem:[%s783_s26 + $0x28] sm:$0xff]   ;;  %v704_v13 = vld [vmem:[%s783_s26 + $0x30] sm:$0xff]  }
  0x15   : > { %647 = vmatpush3.bf16.msra.mxu0 %v296_v5  ;;  %654 = vmatprep.subr.bf16.mxu1 %v730_v0  ;;  %v705_v14 = vld [vmem:[%s783_s26 + $0x38] sm:$0xff]  }
  0x18   : > { %649 = vmatmul.mubr.msk.bf16.vlgmr.msra.gmra.mrb[0].mxu0 %vm299_vm1, %v293_v7  ;;  %655 = vmatpush3.bf16.msra.mxu1 %v699_v8 }
  0x19   : > { %656 = vmatprep.subr.bf16.mxu1 %v730_v0 }
  0x1c   : > { %657 = vmatpush3.bf16.msra.mxu1 %v700_v9 }
  0x1d   : > { %658 = vmatprep.subr.bf16.mxu1 %v730_v0 }
  0x20   : > { %659 = vmatpush3.bf16.msra.mxu1 %v701_v10 }
  0x21   : > { %660 = vmatprep.subr.bf16.mxu1 %v730_v0 }
  0x24   : > { %661 = vmatpush3.bf16.msra.mxu1 %v702_v11 }
  0x25   : > { %662 = vmatprep.subr.bf16.mxu1 %v730_v0 }
  0x28   : > { %663 = vmatpush3.bf16.msra.mxu1 %v703_v12 }
  0x29   : > { %664 = vmatprep.subr.bf16.mxu1 %v730_v0 }
  0x2c   : > { %665 = vmatpush3.bf16.msra.mxu1 %v704_v13 }
  0x2d   : > { %666 = vmatprep.subr.bf16.mxu1 %v730_v0 }
  0x30   : > { %667 = vmatpush3.bf16.msra.mxu1 %v705_v14 }
  0xeb   : > { %v337_v15 = vpop.f32.mrb[0].mxu0 }
  0xec   : > { %v650_v16 = vpop.f32.mrb[1].mxu0 }
  0xed   : > { %v340_v17 = vpop.f32.mrb[2].mxu0 }
  0xee   : > { %v353_v18 = vpack.c.bf16 %v340_v17, %v337_v15  ;;  %v651_v19 = vpop.f32.mrb[3].mxu0 }
  0xf0   : > { %669 = vmatmul.mubr.bf16.vlgmr.msra.gmra.mrb[0].mxu1 %v353_v18 }
 0x1c3   : > { %v452_v20 = vpop.f32.mrb[0].mxu1 }
 0x1c4   : > { %v461_v21 = vmul.f32 0.22916667, %v452_v20  ;;  %v670_v22 = vpop.f32.mrb[1].mxu1  ;;  %vm459_vm2 = vcmp.ge.f32.partialorder %v452_v20, 0.0 }
 0x1c5   : > { %v455_v23 = vpop.f32.mrb[2].mxu1 }
 0x1c6   : > { %vm460_vm3 = vcmp.ge.f32.partialorder %v455_v23, 0.0  ;;  %v462_v24 = vmul.f32 0.22916667, %v455_v23  ;;  %v671_v25 = vpop.f32.mrb[3].mxu1  ;;  %v463_v26 = vsel %vm459_vm2, %v452_v20, %v461_v21 }
 0x1c8   : > { %v464_v27 = vsel %vm460_vm3, %v455_v23, %v462_v24 }
 0x1c9   : > { %v633_v28 = vpack.c.bf16 %v464_v27, %v463_v26 }
 0x1cb   : > { %634 = vst [vmem:[%s282_s30] sm:$0xff] %v633_v28  }
 0x1cc PF: > { %s13_s14 = sadd.s32 1, %s728_s14   ;;  %s810_s12 = smov %s724_s13 }
 0x1cd   : > { %p10_p5 = scmp.ge.s32.totalorder %s13_s14, 5   ;;  %s811_s13 = smov %s813_s15 }
 0x1cf   :  { %12 = sbr.rel (!%p10_p5) target bundleno = 2 (0x2), region = 76 }

// kernel: evolve_gcn_forward.7
= control target key start
LH: loop header
LB: loop body
LE: loop exit
PB: predicated region body
PF: predicated region fallthrough
CT: control target
= control target key end

     0   :  { %s2154_s21 = smov 0   ;;  %s2715_s0 = inlined_call_operand.vmem [shape: bf16[3,128,128], index: 0, kind: input, shape index: {}]   ;;  %s2716_s1 = inlined_call_operand.vmem [shape: f32[128,128], index: 1, kind: input, shape index: {}]   ;;  %s2717_s2 = inlined_call_operand.vmem [shape: bf16[256,256], index: 2, kind: input, shape index: {}]   ;;  %s2718_s3 = inlined_call_operand.vmem [shape: f32[256,128], index: 3, kind: input, shape index: {}]   ;;  %s2719_s4 = inlined_call_operand.vmem [shape: bf16[128,256], index: 4, kind: input, shape index: {}]   ;;  %s2720_s5 = inlined_call_operand.vmem [shape: f32[128,128], index: 5, kind: input, shape index: {}]   ;;  %s2721_s6 = inlined_call_operand.vmem [shape: bf16[3,128,128], index: 6, kind: output, shape index: {}]  }
   0x1 LB: > { %s1474_s22 = sadd.s32 4294967295, %s2117_s21   ;;  %p1478_p0 = scmp.ge.s32.totalorder %s2117_s21, 1  ;;  %s2117_s21 = sphi %s2154_s21, %s16_s21  }
   0x2   : > { %p212_p1 = scmp.lt.s32.totalorder %s2117_s21, 4 }
   0x4   : > { %p213_p2 = pnand %p1478_p0, %p212_p1 }
   0x5   : > { %p242_p3 = scmp.lt.s32.totalorder (!%p213_p2), %s1474_s22, 2  ;;  %p1483_p4 = scmp.ne.s32.totalorder (!%p213_p2), %s1474_s22, 0 }
   0x6   : > { %216 = sbr.rel (%p213_p2) target bundleno = 709 (0x2c5), region = 44 }
   0xd   : > { %s243_s23 = scalar_select %p242_p3, %s1474_s22, 2 }
   0xe   : > { %256 = sbr.rel (%p1483_p4) target bundleno = 23 (0x17), region = 48  ;;  %v257_v0 = vld [vmem:[%s2716_s1] sm:$0xff] (!%p1483_p4)  ;;  %v258_v1 = vld [vmem:[%s2716_s1 + $0x8] sm:$0xff] (!%p1483_p4)  ;;  %v259_v2 = vld [vmem:[%s2716_s1 + $0x10] sm:$0xff] (!%p1483_p4) }
   0xf   : > { %s1590_s24 = sshll.u32 %s243_s23, 6  ;;  %273 = vst [vmem:[#allocation2] sm:$0xff] (!%p1483_p4), %v257_v0  ;;  %274 = vst [vmem:[#allocation2 + $0x8] sm:$0xff] (!%p1483_p4), %v258_v1  ;;  %v260_v3 = vld [vmem:[%s2716_s1 + $0x18] sm:$0xff] (!%p1483_p4)  ;;  %v261_v4 = vld [vmem:[%s2716_s1 + $0x20] sm:$0xff] (!%p1483_p4) }
  0x10   : > { %s2165_s27 = scalar_lea.vmem %s2715_s0, %s1590_s24  ;;  %s2170_s30 = scalar_lea.vmem %s2721_s6, %s1590_s24  ;;  %275 = vst [vmem:[#allocation2 + $0x10] sm:$0xff] (!%p1483_p4), %v259_v2  ;;  %v262_v5 = vld [vmem:[%s2716_s1 + $0x28] sm:$0xff] (!%p1483_p4)  ;;  %276 = vst [vmem:[#allocation2 + $0x18] sm:$0xff] (!%p1483_p4), %v260_v3  ;;  %v263_v6 = vld [vmem:[%s2716_s1 + $0x30] sm:$0xff] (!%p1483_p4) }
  0x11   : > { %277 = vst [vmem:[#allocation2 + $0x20] sm:$0xff] (!%p1483_p4), %v261_v4  ;;  %278 = vst [vmem:[#allocation2 + $0x28] sm:$0xff] (!%p1483_p4), %v262_v5  ;;  %v264_v7 = vld [vmem:[%s2716_s1 + $0x38] sm:$0xff] (!%p1483_p4)  ;;  %v265_v8 = vld [vmem:[%s2716_s1 + $0x40] sm:$0xff] (!%p1483_p4) }
  0x12   : > { %279 = vst [vmem:[#allocation2 + $0x30] sm:$0xff] (!%p1483_p4), %v263_v6  ;;  %280 = vst [vmem:[#allocation2 + $0x38] sm:$0xff] (!%p1483_p4), %v264_v7  ;;  %v266_v9 = vld [vmem:[%s2716_s1 + $0x48] sm:$0xff] (!%p1483_p4)  ;;  %v267_v10 = vld [vmem:[%s2716_s1 + $0x50] sm:$0xff] (!%p1483_p4) }
  0x13   : > { %281 = vst [vmem:[#allocation2 + $0x40] sm:$0xff] (!%p1483_p4), %v265_v8  ;;  %v268_v11 = vld [vmem:[%s2716_s1 + $0x58] sm:$0xff] (!%p1483_p4)  ;;  %282 = vst [vmem:[#allocation2 + $0x48] sm:$0xff] (!%p1483_p4), %v266_v9  ;;  %v269_v12 = vld [vmem:[%s2716_s1 + $0x60] sm:$0xff] (!%p1483_p4) }
  0x14   : > { %283 = vst [vmem:[#allocation2 + $0x50] sm:$0xff] (!%p1483_p4), %v267_v10  ;;  %284 = vst [vmem:[#allocation2 + $0x58] sm:$0xff] (!%p1483_p4), %v268_v11  ;;  %v270_v13 = vld [vmem:[%s2716_s1 + $0x68] sm:$0xff] (!%p1483_p4)  ;;  %v271_v14 = vld [vmem:[%s2716_s1 + $0x70] sm:$0xff] (!%p1483_p4) }
  0x15   : > { %285 = vst [vmem:[#allocation2 + $0x60] sm:$0xff] %v269_v12  ;;  %286 = vst [vmem:[#allocation2 + $0x68] sm:$0xff] %v270_v13  ;;  %v272_v15 = vld [vmem:[%s2716_s1 + $0x78] sm:$0xff] }
  0x16   : > { %287 = vst [vmem:[#allocation2 + $0x70] sm:$0xff] %v271_v14  ;;  %288 = vst [vmem:[#allocation2 + $0x78] sm:$0xff] %v272_v15 }
  0x17 PF: > { %v2227_v19 = vld [vmem:[%s2165_s27] sm:$0xff]   ;;  %v2241_v25 = vld [vmem:[%s2165_s27 + $0x8] sm:$0xff]   ;;  %v2252_v29 = vld [vmem:[%s2165_s27 + $0x10] sm:$0xff]  }
  0x18   : > { %v2220_v16 = vld [vmem:[#allocation2] sm:$0xff]  ;;  %v2222_v17 = vld [vmem:[#allocation2 + $0x8] sm:$0xff]  ;;  %v2263_v33 = vld [vmem:[%s2165_s27 + $0x18] sm:$0xff]  }
  0x19   : > { %v377_v18 = vpack.c.bf16 %v2222_v17, %v2220_v16  ;;  %v2229_v20 = vld [vmem:[#allocation2 + $0x10] sm:$0xff]  ;;  %v2231_v21 = vld [vmem:[#allocation2 + $0x18] sm:$0xff]  ;;  %v1865_v37 = vld [vmem:[%s2717_s2 + $0x4] ss:$8 sps:$4 sm:$0xff]  }
  0x1a   : > { %v378_v22 = vpack.c.bf16 %v2231_v21, %v2229_v20  ;;  %v2235_v23 = vld [vmem:[#allocation2 + $0x20] sm:$0xff]  ;;  %v2237_v24 = vld [vmem:[#allocation2 + $0x28] sm:$0xff]  ;;  %665 = vmatprep.mubr.bf16.mxu0 %v1865_v37  ;;  %v2299_v46 = vld [vmem:[%s2165_s27 + $0x30] sm:$0xff]  }
  0x1b   : > { %1655 = vmatprep.subr.bf16.mxu0 %v377_v18  ;;  %1831 = vmatprep.subr.bf16.mxu1 %v377_v18  ;;  %v379_v26 = vpack.c.bf16 %v2237_v24, %v2235_v23  ;;  %v2246_v27 = vld [vmem:[#allocation2 + $0x30] sm:$0xff]  ;;  %v2248_v28 = vld [vmem:[#allocation2 + $0x38] sm:$0xff]  ;;  %v2277_v38 = vld [vmem:[%s2165_s27 + $0x20] sm:$0xff]  }
  0x1c   : > { %1656 = vmatpush3.bf16.msra.mxu0 %v2227_v19  ;;  %1839 = vmatpush3.bf16.msra.mxu1 %v2227_v19  ;;  %v380_v30 = vpack.c.bf16 %v2248_v28, %v2246_v27  ;;  %v2257_v31 = vld [vmem:[#allocation2 + $0x40] sm:$0xff]  ;;  %v2259_v32 = vld [vmem:[#allocation2 + $0x48] sm:$0xff]  ;;  %v2309_v49 = vld [vmem:[%s2165_s27 + $0x38] sm:$0xff]  }
  0x1d   : > { %1657 = vmatprep.subr.bf16.mxu0 %v378_v22  ;;  %1832 = vmatprep.subr.bf16.mxu1 %v378_v22  ;;  %v381_v34 = vpack.c.bf16 %v2259_v32, %v2257_v31  ;;  %v2268_v35 = vld [vmem:[#allocation2 + $0x50] sm:$0xff]  ;;  %v2270_v36 = vld [vmem:[#allocation2 + $0x58] sm:$0xff]  ;;  %v2282_v40 = vld [vmem:[#allocation2 + $0x60] sm:$0xff] }
  0x1e   : > { %v382_v39 = vpack.c.bf16 %v2270_v36, %v2268_v35  ;;  %v2284_v41 = vld [vmem:[#allocation2 + $0x68] sm:$0xff]  ;;  %v2293_v44 = vld [vmem:[#allocation2 + $0x70] sm:$0xff]  ;;  %v2295_v45 = vld [vmem:[#allocation2 + $0x78] sm:$0xff] }
  0x1f   : > { %v2288_v42 = vld [vmem:[%s2165_s27 + $0x28] sm:$0xff]   ;;  %v383_v43 = vpack.c.bf16 %v2284_v41, %v2282_v40  ;;  %v384_v47 = vpack.c.bf16 %v2295_v45, %v2293_v44  ;;  %v1866_v51 = vld [vmem:[%s2717_s2 + $0x14] ss:$8 sps:$4 sm:$0xff]   ;;  %v1868_v54 = vld [vmem:[%s2717_s2 + $0x10] ss:$8 sps:$4 sm:$0xff]  }
  0x20   : > { %1658 = vmatpush3.bf16.msra.mxu0 %v2241_v25  ;;  %1840 = vmatpush3.bf16.msra.mxu1 %v2241_v25  ;;  %v1895_v48 = vld [vmem:[%s2717_s2 + $0xc4] ss:$8 sps:$4 sm:$0xff]   ;;  %v1863_v50 = vld [vmem:[%s2717_s2] ss:$8 sps:$4 sm:$0xff]   ;;  %v1899_v53 = vld [vmem:[%s2717_s2 + $0xd4] ss:$8 sps:$4 sm:$0xff]  }
  0x21   : > { %1659 = vmatprep.subr.bf16.mxu0 %v379_v26  ;;  %1833 = vmatprep.subr.bf16.mxu1 %v379_v26  ;;  %v1893_v52 = vld [vmem:[%s2717_s2 + $0xc0] ss:$8 sps:$4 sm:$0xff]   ;;  %v1869_v55 = vld [vmem:[%s2717_s2 + $0x24] ss:$8 sps:$4 sm:$0xff]   ;;  %v1901_v56 = vld [vmem:[%s2717_s2 + $0xd0] ss:$8 sps:$4 sm:$0xff]  }
  0x22   : > { %761 = vmatprep.mubr.bf16.mxu1 %v1895_v48  ;;  %v1905_v57 = vld [vmem:[%s2717_s2 + $0xe4] ss:$8 sps:$4 sm:$0xff]   ;;  %v1871_v58 = vld [vmem:[%s2717_s2 + $0x20] ss:$8 sps:$4 sm:$0xff]   ;;  %v1872_v59 = vld [vmem:[%s2717_s2 + $0x34] ss:$8 sps:$4 sm:$0xff]  }
  0x23   : > { %v1907_v60 = vld [vmem:[%s2717_s2 + $0xe0] ss:$8 sps:$4 sm:$0xff]   ;;  %v1908_v61 = vld [vmem:[%s2717_s2 + $0xf4] ss:$8 sps:$4 sm:$0xff]   ;;  %v1874_v62 = vld [vmem:[%s2717_s2 + $0x30] ss:$8 sps:$4 sm:$0xff]  }
  0x24   : > { %1660 = vmatpush3.bf16.msra.mxu0 %v2252_v29  ;;  %1841 = vmatpush3.bf16.msra.mxu1 %v2252_v29  ;;  %v1875_v63 = vld [vmem:[%s2717_s2 + $0x44] ss:$8 sps:$4 sm:$0xff]   ;;  %v1910_v0 = vld [vmem:[%s2717_s2 + $0xf0] ss:$8 sps:$4 sm:$0xff]   ;;  %v1877_v1 = vld [vmem:[%s2717_s2 + $0x40] ss:$8 sps:$4 sm:$0xff]  }
  0x25   : > { %1661 = vmatprep.subr.bf16.mxu0 %v380_v30  ;;  %1834 = vmatprep.subr.bf16.mxu1 %v380_v30  ;;  %v1878_v2 = vld [vmem:[%s2717_s2 + $0x54] ss:$8 sps:$4 sm:$0xff]   ;;  %v1880_v3 = vld [vmem:[%s2717_s2 + $0x50] ss:$8 sps:$4 sm:$0xff]   ;;  %v1881_v4 = vld [vmem:[%s2717_s2 + $0x64] ss:$8 sps:$4 sm:$0xff]  }
  0x26   : > { %v1883_v5 = vld [vmem:[%s2717_s2 + $0x60] ss:$8 sps:$4 sm:$0xff]   ;;  %v1884_v6 = vld [vmem:[%s2717_s2 + $0x74] ss:$8 sps:$4 sm:$0xff]   ;;  %v1886_v7 = vld [vmem:[%s2717_s2 + $0x70] ss:$8 sps:$4 sm:$0xff]  }
  0x27   : > { %v1887_v8 = vld [vmem:[%s2717_s2 + $0x84] ss:$8 sps:$4 sm:$0xff]   ;;  %v1889_v9 = vld [vmem:[%s2717_s2 + $0x80] ss:$8 sps:$4 sm:$0xff]   ;;  %v1890_v10 = vld [vmem:[%s2717_s2 + $0x94] ss:$8 sps:$4 sm:$0xff]  }
  0x28   : > { %1662 = vmatpush3.bf16.msra.mxu0 %v2263_v33  ;;  %1842 = vmatpush3.bf16.msra.mxu1 %v2263_v33  ;;  %v1892_v11 = vld [vmem:[%s2717_s2 + $0x90] ss:$8 sps:$4 sm:$0xff]   ;;  %v1896_v12 = vld [vmem:[%s2717_s2 + $0xa4] ss:$8 sps:$4 sm:$0xff]   ;;  %v1898_v13 = vld [vmem:[%s2717_s2 + $0xa0] ss:$8 sps:$4 sm:$0xff]  }
  0x29   : > { %1663 = vmatprep.subr.bf16.mxu0 %v381_v34  ;;  %1835 = vmatprep.subr.bf16.mxu1 %v381_v34  ;;  %v1902_v14 = vld [vmem:[%s2717_s2 + $0xb4] ss:$8 sps:$4 sm:$0xff]   ;;  %v1904_v15 = vld [vmem:[%s2717_s2 + $0xb0] ss:$8 sps:$4 sm:$0xff]   ;;  %v465_v37 = vld [vmem:[%s2718_s3 + $0xc0] sm:$0xff] }
  0x2c   : > { %1664 = vmatpush3.bf16.msra.mxu0 %v2277_v38  ;;  %1843 = vmatpush3.bf16.msra.mxu1 %v2277_v38 }
  0x2d   : > { %1665 = vmatprep.subr.bf16.mxu0 %v382_v39  ;;  %1836 = vmatprep.subr.bf16.mxu1 %v382_v39 }
  0x30   : > { %1666 = vmatpush3.bf16.msra.mxu0 %v2288_v42  ;;  %1844 = vmatpush3.bf16.msra.mxu1 %v2288_v42 }
  0x31   : > { %1667 = vmatprep.subr.bf16.mxu0 %v383_v43  ;;  %1837 = vmatprep.subr.bf16.mxu1 %v383_v43 }
  0x34   : > { %1668 = vmatpush3.bf16.msra.mxu0 %v2299_v46  ;;  %1845 = vmatpush3.bf16.msra.mxu1 %v2299_v46 }
  0x35   : > { %1669 = vmatprep.subr.bf16.mxu0 %v384_v47  ;;  %1838 = vmatprep.subr.bf16.mxu1 %v384_v47 }
  0x38   : > { %1670 = vmatpush3.bf16.msra.mxu0 %v2309_v49  ;;  %1846 = vmatpush3.bf16.msra.mxu1 %v2309_v49 }
  0x3b   : > { %666 = vmatmul.mubr.bf16.vlgmr.msra.gmra.mrb[0].mxu0 %v1863_v50  ;;  %762 = vmatmul.mubr.bf16.vlgmr.msra.gmra.mrb[0].mxu1 %v1893_v52 }
  0x3c   : > { %673 = vmatprep.mubr.bf16.mxu0 %v1866_v51  ;;  %769 = vmatprep.mubr.bf16.mxu1 %v1899_v53  ;;  %v466_v51 = vld [vmem:[%s2718_s3 + $0xc8] sm:$0xff] }
  0x43   : > { %674 = vmatmul.mubr.bf16.gmra.mrb[4].mxu0 %v1868_v54  ;;  %770 = vmatmul.mubr.bf16.gmra.mrb[4].mxu1 %v1901_v56 }
  0x44   : > { %681 = vmatprep.mubr.bf16.mxu0 %v1869_v55  ;;  %777 = vmatprep.mubr.bf16.mxu1 %v1905_v57 }
  0x4b   : > { %682 = vmatmul.mubr.bf16.gmra.mrb[8].mxu0 %v1871_v58  ;;  %778 = vmatmul.mubr.bf16.gmra.mrb[8].mxu1 %v1907_v60 }
  0x4c   : > { %689 = vmatprep.mubr.bf16.mxu0 %v1872_v59  ;;  %785 = vmatprep.mubr.bf16.mxu1 %v1908_v61 }
  0x53   : > { %690 = vmatmul.mubr.bf16.gmra.mrb[12].mxu0 %v1874_v62  ;;  %786 = vmatmul.mubr.bf16.gmra.mrb[12].mxu1 %v1910_v0 }
  0x54   : > { %697 = vmatprep.mubr.bf16.mxu0 %v1875_v63  ;;  %v467_v63 = vld [vmem:[%s2718_s3 + $0xd0] sm:$0xff] }
  0x5b   : > { %698 = vmatmul.mubr.bf16.gmra.mrb[16].mxu0 %v1877_v1 }
  0x5c   : > { %705 = vmatprep.mubr.bf16.mxu0 %v1878_v2 }
  0x63   : > { %706 = vmatmul.mubr.bf16.gmra.mrb[20].mxu0 %v1880_v3 }
  0x64   : > { %713 = vmatprep.mubr.bf16.mxu0 %v1881_v4 }
  0x6b   : > { %714 = vmatmul.mubr.bf16.gmra.mrb[24].mxu0 %v1883_v5  ;;  %v468_v5 = vld [vmem:[%s2718_s3 + $0xd8] sm:$0xff] }
  0x6c   : > { %721 = vmatprep.mubr.bf16.mxu0 %v1884_v6 }
  0x73   : > { %722 = vmatmul.mubr.bf16.gmra.mrb[28].mxu0 %v1886_v7 }
  0x74   : > { %729 = vmatprep.mubr.bf16.mxu0 %v1887_v8 }
  0x7b   : > { %730 = vmatmul.mubr.bf16.gmra.mrb[32].mxu0 %v1889_v9 }
  0x7c   : > { %737 = vmatprep.mubr.bf16.mxu0 %v1890_v10 }
  0x83   : > { %738 = vmatmul.mubr.bf16.gmra.mrb[36].mxu0 %v1892_v11  ;;  %v1913_v11 = vld [vmem:[%s2719_s4 + $0x4] ss:$8 sps:$4 sm:$0xff]  }
  0x84   : > { %745 = vmatprep.mubr.bf16.mxu0 %v1896_v12  ;;  %1178 = vmatprep.mubr.bf16.mxu1 %v1913_v11 }
  0x8b   : > { %746 = vmatmul.mubr.bf16.gmra.mrb[40].mxu0 %v1898_v13 }
  0x8c   : > { %753 = vmatprep.mubr.bf16.mxu0 %v1902_v14 }
  0x93   : > { %754 = vmatmul.mubr.bf16.gmra.mrb[44].mxu0 %v1904_v15 }
 0x10e   : > { %v1671_v18 = vpop.f32.mrb[0].mxu0  ;;  %v1743_v26 = vpop.f32.mrb[0].mxu1 }
 0x10f   : > { %v1672_v22 = vpop.f32.mrb[1].mxu0  ;;  %v1744_v39 = vpop.f32.mrb[1].mxu1 }
 0x110   : > { %v2404_v30 = vadd.f32 %v1672_v22, %v1671_v18  ;;  %v1674_v34 = vpop.f32.mrb[2].mxu0  ;;  %v1745_v47 = vadd.f32 %v1744_v39, %v1743_v26  ;;  %v1746_v48 = vpop.f32.mrb[2].mxu1  ;;  %v469_v26 = vld [vmem:[%s2718_s3 + $0xe0] sm:$0xff] }
 0x111   : > { %v1675_v43 = vpop.f32.mrb[3].mxu0  ;;  %v1747_v52 = vpop.f32.mrb[3].mxu1 }
 0x112   : > { %v2409_v50 = vadd.f32 %v1675_v43, %v1674_v34  ;;  %v764_v53 = vadd.f32 %v1745_v47, %v465_v37  ;;  %v1748_v54 = vadd.f32 %v1747_v52, %v1746_v48  ;;  %v470_v52 = vld [vmem:[%s2718_s3 + $0xe8] sm:$0xff] }
 0x114   : > { %v1548_v55 = vmul.f32 -1.442695, %v764_v53  ;;  %v767_v56 = vadd.f32 %v1748_v54, %v466_v51 }
 0x116   : > { %v1677_v57 = vpop.f32.mrb[4].mxu0  ;;  %1935 = vpow2.f32 %v1548_v55  ;;  %v1549_v59 = vmul.f32 -1.442695, %v767_v56  ;;  %v1749_v60 = vpop.f32.mrb[4].mxu1 }
 0x117   : > { %v1678_v58 = vpop.f32.mrb[5].mxu0  ;;  %v1750_v0 = vpop.f32.mrb[5].mxu1 }
 0x118   : > { %v2414_v61 = vadd.f32 %v1678_v58, %v1677_v57  ;;  %v1680_v62 = vpop.f32.mrb[6].mxu0  ;;  %1937 = vpow2.f32 %v1549_v59  ;;  %v1751_v2 = vadd.f32 %v1750_v0, %v1749_v60  ;;  %v1752_v3 = vpop.f32.mrb[6].mxu1 }
 0x119   : > { %v1681_v1 = vpop.f32.mrb[7].mxu0  ;;  %v1753_v6 = vpop.f32.mrb[7].mxu1 }
 0x11a   : > { %v2419_v4 = vadd.f32 %v1681_v1, %v1680_v62  ;;  %v772_v7 = vadd.f32 %v1751_v2, %v467_v63  ;;  %v1754_v8 = vadd.f32 %v1753_v6, %v1752_v3  ;;  %v471_v3 = vld [vmem:[%s2718_s3 + $0xf0] sm:$0xff] }
 0x11c   : > { %v1550_v9 = vmul.f32 -1.442695, %v772_v7  ;;  %v775_v10 = vadd.f32 %v1754_v8, %v468_v5 }
 0x11e   : > { %v1683_v12 = vpop.f32.mrb[8].mxu0  ;;  %1939 = vpow2.f32 %v1550_v9  ;;  %v1551_v14 = vmul.f32 -1.442695, %v775_v10  ;;  %v1755_v15 = vpop.f32.mrb[8].mxu1 }
 0x11f   : > { %v1684_v13 = vpop.f32.mrb[9].mxu0  ;;  %v1756_v34 = vpop.f32.mrb[9].mxu1 }
 0x120   : > { %v2427_v18 = vadd.f32 %v1684_v13, %v1683_v12  ;;  %v1686_v22 = vpop.f32.mrb[10].mxu0  ;;  %v1936_v37 = vpop.eup %1935  ;;  %1941 = vpow2.f32 %v1551_v14  ;;  %v1757_v43 = vadd.f32 %v1756_v34, %v1755_v15  ;;  %v472_v12 = vld [vmem:[%s2718_s3 + $0xf8] sm:$0xff] }
 0x121   : > { %v1687_v39 = vpop.f32.mrb[11].mxu0  ;;  %v1758_v47 = vpop.f32.mrb[10].mxu1  ;;  %v914_v51 = vadd.f32 1.0, %v1936_v37 }
 0x122   : > { %v2432_v48 = vadd.f32 %v1687_v39, %v1686_v22  ;;  %v1759_v53 = vpop.f32.mrb[11].mxu1  ;;  %v1938_v54 = vpop.eup %1937  ;;  %v780_v55 = vadd.f32 %v1757_v43, %v469_v26 }
 0x123   : > { %v1760_v56 = vadd.f32 %v1759_v53, %v1758_v47  ;;  %1943 = vrcp.f32 %v914_v51  ;;  %v915_v57 = vadd.f32 1.0, %v1938_v54 }
 0x124   : > { %v1552_v58 = vmul.f32 -1.442695, %v780_v55 }
 0x125   : > { %v783_v59 = vadd.f32 %v1760_v56, %v470_v52  ;;  %1945 = vrcp.f32 %v915_v57 }
 0x126   : > { %v1689_v60 = vpop.f32.mrb[12].mxu0  ;;  %v1761_v0 = vpop.f32.mrb[12].mxu1  ;;  %1947 = vpow2.f32 %v1552_v58 }
 0x127   : > { %v1690_v62 = vpop.f32.mrb[13].mxu0  ;;  %v1553_v63 = vmul.f32 -1.442695, %v783_v59  ;;  %v1762_v5 = vpop.f32.mrb[13].mxu1 }
 0x128   : > { %v2437_v1 = vadd.f32 %v1690_v62, %v1689_v60  ;;  %v1692_v2 = vpop.f32.mrb[14].mxu0  ;;  %v1940_v6 = vpop.eup %1939  ;;  %v1763_v8 = vadd.f32 %v1762_v5, %v1761_v0 }
 0x129   : > { %v1693_v7 = vpop.f32.mrb[15].mxu0  ;;  %v1764_v9 = vpop.f32.mrb[14].mxu1  ;;  %v916_v11 = vadd.f32 1.0, %v1940_v6  ;;  %1949 = vpow2.f32 %v1553_v63 }
 0x12a   : > { %v2442_v10 = vadd.f32 %v1693_v7, %v1692_v2  ;;  %v1765_v13 = vpop.f32.mrb[15].mxu1  ;;  %v1942_v14 = vpop.eup %1941  ;;  %v788_v15 = vadd.f32 %v1763_v8, %v471_v3 }
 0x12b   : > { %v1766_v22 = vadd.f32 %v1765_v13, %v1764_v9  ;;  %1951 = vrcp.f32 %v916_v11  ;;  %v917_v26 = vadd.f32 1.0, %v1942_v14 }
 0x12c   : > { %v1554_v34 = vmul.f32 -1.442695, %v788_v15 }
 0x12d   : > { %v791_v37 = vadd.f32 %v1766_v22, %v472_v12  ;;  %v1944_v39 = vpop.eup %1943  ;;  %1953 = vrcp.f32 %v917_v26 }
 0x12e   : > { %v1695_v43 = vpop.f32.mrb[16].mxu0  ;;  %v2450_v54 = vmul.f32 %v1944_v39, %v2257_v31  ;;  %1955 = vpow2.f32 %v1554_v34 }
 0x12f   : > { %v1696_v47 = vpop.f32.mrb[17].mxu0  ;;  %v1555_v51 = vmul.f32 -1.442695, %v791_v37  ;;  %v1946_v55 = vpop.eup %1945 }
 0x130   : > { %v2447_v52 = vadd.f32 %v1696_v47, %v1695_v43  ;;  %v1698_v53 = vpop.f32.mrb[18].mxu0  ;;  %v2455_v58 = vmul.f32 %v1946_v55, %v2259_v32  ;;  %v1948_v59 = vpop.eup %1947 }
 0x131   : > { %v1699_v56 = vpop.f32.mrb[19].mxu0  ;;  %1957 = vpow2.f32 %v1555_v51  ;;  %v918_v62 = vadd.f32 1.0, %v1948_v59 }
 0x132   : > { %v2452_v57 = vadd.f32 %v1699_v56, %v1698_v53  ;;  %v1006_v63 = vpack.c.bf16 %v2455_v58, %v2450_v54  ;;  %v1928_v54 = vld [vmem:[%s2719_s4 + $0x50] ss:$8 sps:$4 sm:$0xff]   ;;  %v1929_v58 = vld [vmem:[%s2719_s4 + $0x64] ss:$8 sps:$4 sm:$0xff]  }
 0x133   : > { %v1950_v60 = vpop.eup %1949  ;;  %1959 = vrcp.f32 %v918_v62 }
 0x134   : > { %v919_v0 = vadd.f32 1.0, %v1950_v60 }
 0x135   : > { %v1952_v2 = vpop.eup %1951 }
 0x136   : > { %v1701_v3 = vpop.f32.mrb[20].mxu0  ;;  %v2462_v7 = vmul.f32 %v1952_v2, %v2268_v35  ;;  %1961 = vrcp.f32 %v919_v0 }
 0x137   : > { %v1702_v31 = vpop.f32.mrb[21].mxu0  ;;  %v1954_v8 = vpop.eup %1953 }
 0x138   : > { %v2459_v5 = vadd.f32 %v1702_v31, %v1701_v3  ;;  %v1704_v6 = vpop.f32.mrb[22].mxu0  ;;  %v2467_v11 = vmul.f32 %v1954_v8, %v2270_v36  ;;  %v1956_v12 = vpop.eup %1955 }
 0x139   : > { %v1705_v32 = vpop.f32.mrb[23].mxu0  ;;  %v920_v14 = vadd.f32 1.0, %v1956_v12 }
 0x13a   : > { %v2464_v9 = vadd.f32 %v1705_v32, %v1704_v6  ;;  %v1007_v15 = vpack.c.bf16 %v2467_v11, %v2462_v7  ;;  %v457_v32 = vld [vmem:[%s2718_s3 + $0x80] sm:$0xff]  ;;  %v1932_v7 = vld [vmem:[%s2719_s4 + $0x74] ss:$8 sps:$4 sm:$0xff]   ;;  %v1934_v11 = vld [vmem:[%s2719_s4 + $0x70] ss:$8 sps:$4 sm:$0xff]  }
 0x13b   : > { %v1958_v13 = vpop.eup %1957  ;;  %1963 = vrcp.f32 %v920_v14 }
 0x13c   : > { %v921_v22 = vadd.f32 1.0, %v1958_v13 }
 0x13d   : > { %v1960_v39 = vpop.eup %1959 }
 0x13e   : > { %v1707_v26 = vpop.f32.mrb[24].mxu0  ;;  %1965 = vrcp.f32 %v921_v22  ;;  %v2476_v36 = vmul.f32 %v1960_v39, %v2282_v40 }
 0x13f   : > { %v1708_v34 = vpop.f32.mrb[25].mxu0 }
 0x140   : > { %v2471_v35 = vadd.f32 %v1708_v34, %v1707_v26  ;;  %v1710_v37 = vpop.f32.mrb[26].mxu0  ;;  %v1962_v51 = vpop.eup %1961 }
 0x141   : > { %v1711_v43 = vpop.f32.mrb[27].mxu0  ;;  %v2479_v53 = vmul.f32 %v1962_v51, %v2284_v41  ;;  %v459_v51 = vld [vmem:[%s2718_s3 + $0x90] sm:$0xff] }
 0x142   : > { %v2473_v47 = vadd.f32 %v1711_v43, %v1710_v37 }
 0x143   : > { %v1008_v56 = vpack.c.bf16 %v2479_v53, %v2476_v36  ;;  %v442_v53 = vld [vmem:[%s2718_s3 + $0x8] sm:$0xff] }
 0x145   : > { %v1964_v0 = vpop.eup %1963 }
 0x146   : > { %v1713_v55 = vpop.f32.mrb[28].mxu0  ;;  %v2488_v31 = vmul.f32 %v1964_v0, %v2293_v44  ;;  %v458_v44 = vld [vmem:[%s2718_s3 + $0x88] sm:$0xff]  ;;  %v460_v0 = vld [vmem:[%s2718_s3 + $0x98] sm:$0xff] }
 0x147   : > { %v1714_v59 = vpop.f32.mrb[29].mxu0 }
 0x148   : > { %v2483_v60 = vadd.f32 %v1714_v59, %v1713_v55  ;;  %v1716_v62 = vpop.f32.mrb[30].mxu0  ;;  %v1966_v40 = vpop.eup %1965 }
 0x149   : > { %v1717_v2 = vpop.f32.mrb[31].mxu0  ;;  %v2491_v6 = vmul.f32 %v1966_v40, %v2295_v45 }
 0x14a   : > { %v2485_v3 = vadd.f32 %v1717_v2, %v1716_v62 }
 0x14e   : > { %v1719_v41 = vpop.f32.mrb[32].mxu0 }
 0x14f   : > { %v1720_v12 = vpop.f32.mrb[33].mxu0 }
 0x150   : > { %v1721_v13 = vadd.f32 %v1720_v12, %v1719_v41  ;;  %v1722_v14 = vpop.f32.mrb[34].mxu0 }
 0x151   : > { %v1723_v22 = vpop.f32.mrb[35].mxu0 }
 0x152   : > { %v732_v26 = vadd.f32 %v1721_v13, %v457_v32  ;;  %v1724_v34 = vadd.f32 %v1723_v22, %v1722_v14 }
 0x154   : > { %v1540_v45 = vmul.f32 -1.442695, %v732_v26  ;;  %v735_v37 = vadd.f32 %v1724_v34, %v458_v44  ;;  %v461_v44 = vld [vmem:[%s2718_s3 + $0xa0] sm:$0xff] }
 0x156   : > { %1967 = vpow2.f32 %v1540_v45  ;;  %v1541_v39 = vmul.f32 -1.442695, %v735_v37  ;;  %v1725_v43 = vpop.f32.mrb[36].mxu0 }
 0x157   : > { %v1726_v55 = vpop.f32.mrb[37].mxu0 }
 0x158   : > { %1969 = vpow2.f32 %v1541_v39  ;;  %v1727_v59 = vadd.f32 %v1726_v55, %v1725_v43  ;;  %v1728_v62 = vpop.f32.mrb[38].mxu0  ;;  %v462_v39 = vld [vmem:[%s2718_s3 + $0xa8] sm:$0xff] }
 0x159   : > { %v1729_v2 = vpop.f32.mrb[39].mxu0 }
 0x15a   : > { %v740_v40 = vadd.f32 %v1727_v59, %v459_v51  ;;  %v1730_v41 = vadd.f32 %v1729_v2, %v1728_v62 }
 0x15c   : > { %v1542_v32 = vmul.f32 -1.442695, %v740_v40  ;;  %v743_v12 = vadd.f32 %v1730_v41, %v460_v0 }
 0x15e   : > { %1971 = vpow2.f32 %v1542_v32  ;;  %v1543_v13 = vmul.f32 -1.442695, %v743_v12  ;;  %v1731_v14 = vpop.f32.mrb[40].mxu0  ;;  %v463_v32 = vld [vmem:[%s2718_s3 + $0xb0] sm:$0xff] }
 0x15f   : > { %v1732_v22 = vpop.f32.mrb[41].mxu0 }
 0x160   : > { %v1968_v26 = vpop.eup %1967  ;;  %1973 = vpow2.f32 %v1543_v13  ;;  %v1733_v34 = vadd.f32 %v1732_v22, %v1731_v14  ;;  %v1734_v45 = vpop.f32.mrb[42].mxu0 }
 0x161   : > { %v906_v37 = vadd.f32 1.0, %v1968_v26  ;;  %v1735_v43 = vpop.f32.mrb[43].mxu0 }
 0x162   : > { %v1970_v51 = vpop.eup %1969  ;;  %v748_v55 = vadd.f32 %v1733_v34, %v461_v44  ;;  %v1736_v59 = vadd.f32 %v1735_v43, %v1734_v45  ;;  %v464_v44 = vld [vmem:[%s2718_s3 + $0xb8] sm:$0xff] }
 0x163   : > { %1975 = vrcp.f32 %v906_v37  ;;  %v907_v62 = vadd.f32 1.0, %v1970_v51 }
 0x164   : > { %v1544_v0 = vmul.f32 -1.442695, %v748_v55  ;;  %v751_v2 = vadd.f32 %v1736_v59, %v462_v39 }
 0x165   : > { %1977 = vrcp.f32 %v907_v62 }
 0x166   : > { %1979 = vpow2.f32 %v1544_v0  ;;  %v1545_v40 = vmul.f32 -1.442695, %v751_v2  ;;  %v1737_v41 = vpop.f32.mrb[44].mxu0 }
 0x167   : > { %v1738_v12 = vpop.f32.mrb[45].mxu0 }
 0x168   : > { %v1972_v13 = vpop.eup %1971  ;;  %1981 = vpow2.f32 %v1545_v40  ;;  %v1739_v14 = vadd.f32 %v1738_v12, %v1737_v41  ;;  %v1740_v22 = vpop.f32.mrb[46].mxu0 }
 0x169   : > { %v908_v26 = vadd.f32 1.0, %v1972_v13  ;;  %v1741_v34 = vpop.f32.mrb[47].mxu0 }
 0x16a   : > { %v1974_v45 = vpop.eup %1973  ;;  %v756_v37 = vadd.f32 %v1739_v14, %v463_v32  ;;  %v1742_v39 = vadd.f32 %v1741_v34, %v1740_v22 }
 0x16b   : > { %1983 = vrcp.f32 %v908_v26  ;;  %v909_v43 = vadd.f32 1.0, %v1974_v45 }
 0x16c   : > { %v1546_v51 = vmul.f32 -1.442695, %v756_v37  ;;  %v759_v55 = vadd.f32 %v1742_v39, %v464_v44 }
 0x16d   : > { %v1976_v59 = vpop.eup %1975  ;;  %1985 = vrcp.f32 %v909_v43 }
 0x16e   : > { %1987 = vpow2.f32 %v1546_v51  ;;  %v1547_v62 = vmul.f32 -1.442695, %v759_v55  ;;  %v986_v40 = vmul.f32 %v1976_v59, %v2220_v16 }
 0x16f   : > { %v1978_v0 = vpop.eup %1977 }
 0x170   : > { %v1980_v2 = vpop.eup %1979  ;;  %1989 = vpow2.f32 %v1547_v62  ;;  %v987_v41 = vmul.f32 %v1978_v0, %v2222_v17 }
 0x171   : > { %v910_v12 = vadd.f32 1.0, %v1980_v2 }
 0x172   : > { %v1982_v13 = vpop.eup %1981  ;;  %v1002_v8 = vpack.c.bf16 %v987_v41, %v986_v40  ;;  %v444_v40 = vld [vmem:[%s2718_s3 + $0x18] sm:$0xff] }
 0x173   : > { %1991 = vrcp.f32 %v910_v12  ;;  %v911_v32 = vadd.f32 1.0, %v1982_v13 }
 0x174   : > { %1767 = vmatprep.subr.bf16.mxu1 %v1002_v8 }
 0x175   : > { %v1984_v14 = vpop.eup %1983  ;;  %1993 = vrcp.f32 %v911_v32  ;;  %1768 = vmatpush3.bf16.msra.mxu1 %v2227_v19 }
 0x176   : > { %v988_v44 = vmul.f32 %v1984_v14, %v2229_v20 }
 0x177   : > { %v1986_v22 = vpop.eup %1985 }
 0x178   : > { %v1988_v26 = vpop.eup %1987  ;;  %v989_v34 = vmul.f32 %v1986_v22, %v2231_v21 }
 0x179   : > { %v912_v45 = vadd.f32 1.0, %v1988_v26 }
 0x17a   : > { %v1990_v16 = vpop.eup %1989  ;;  %v1003_v37 = vpack.c.bf16 %v989_v34, %v988_v44 }
 0x17b   : > { %1995 = vrcp.f32 %v912_v45  ;;  %v913_v17 = vadd.f32 1.0, %v1990_v16 }
 0x17c   : > { %1769 = vmatprep.subr.bf16.mxu1 %v1003_v37 }
 0x17d   : > { %v1992_v39 = vpop.eup %1991  ;;  %1997 = vrcp.f32 %v913_v17  ;;  %1770 = vmatpush3.bf16.msra.mxu1 %v2241_v25  ;;  %v1914_v25 = vld [vmem:[%s2719_s4 + $0x14] ss:$8 sps:$4 sm:$0xff]  }
 0x17e   : > { %v990_v43 = vmul.f32 %v1992_v39, %v2235_v23  ;;  %v2722_v23 = vpack.c.bf16 %v2491_v6, %v2488_v31  ;;  %v443_v6 = vld [vmem:[%s2718_s3 + $0x10] sm:$0xff] }
 0x17f   : > { %v1994_v8 = vpop.eup %1993  ;;  %v676_v2 = vadd.f32 %v2414_v61, %v443_v6  ;;  %v446_v61 = vld [vmem:[%s2718_s3 + $0x28] sm:$0xff] }
 0x180   : > { %v991_v19 = vmul.f32 %v1994_v8, %v2237_v24  ;;  %v1911_v24 = vld [vmem:[%s2719_s4] ss:$8 sps:$4 sm:$0xff]   ;;  %v687_v14 = vadd.f32 %v2432_v48, %v446_v61 }
 0x181   : > { %v1526_v41 = vmul.f32 -1.442695, %v676_v2  ;;  %v1050_v8 = vld [vmem:[%s2720_s5] sm:$0xff] }
 0x182   : > { %v1004_v51 = vpack.c.bf16 %v991_v19, %v990_v43  ;;  %v1529_v34 = vmul.f32 -1.442695, %v687_v14 }
 0x184   : > { %1771 = vmatprep.subr.bf16.mxu1 %v1004_v51 }
 0x185   : > { %v1996_v20 = vpop.eup %1995  ;;  %1772 = vmatpush3.bf16.msra.mxu1 %v2252_v29  ;;  %v1919_v29 = vld [vmem:[%s2719_s4 + $0x20] ss:$8 sps:$4 sm:$0xff]  }
 0x186   : > { %v992_v55 = vmul.f32 %v1996_v20, %v2246_v27  ;;  %v1916_v27 = vld [vmem:[%s2719_s4 + $0x10] ss:$8 sps:$4 sm:$0xff]  }
 0x187   : > { %v1998_v21 = vpop.eup %1997 }
 0x188   : > { %v993_v59 = vmul.f32 %v1998_v21, %v2248_v28  ;;  %v1917_v28 = vld [vmem:[%s2719_s4 + $0x24] ss:$8 sps:$4 sm:$0xff]  }
 0x18a   : > { %v1005_v62 = vpack.c.bf16 %v993_v59, %v992_v55  ;;  %v1051_v55 = vld [vmem:[%s2720_s5 + $0x8] sm:$0xff] }
 0x18c   : > { %1773 = vmatprep.subr.bf16.mxu1 %v1005_v62 }
 0x18d   : > { %1774 = vmatpush3.bf16.msra.mxu1 %v2263_v33  ;;  %v1920_v33 = vld [vmem:[%s2719_s4 + $0x34] ss:$8 sps:$4 sm:$0xff]  }
 0x18e   : > { %1775 = vmatprep.subr.bf16.mxu1 %v1006_v63  ;;  %v1931_v63 = vld [vmem:[%s2719_s4 + $0x60] ss:$8 sps:$4 sm:$0xff]  }
 0x191   : > { %1776 = vmatpush3.bf16.msra.mxu1 %v2277_v38  ;;  %v1922_v38 = vld [vmem:[%s2719_s4 + $0x30] ss:$8 sps:$4 sm:$0xff]  }
 0x192   : > { %1777 = vmatprep.subr.bf16.mxu1 %v1007_v15  ;;  %v441_v15 = vld [vmem:[%s2718_s3] sm:$0xff] }
 0x193   : > { %v668_v36 = vadd.f32 %v2404_v30, %v441_v15  ;;  %v679_v30 = vadd.f32 %v2419_v4, %v444_v40  ;;  %v447_v4 = vld [vmem:[%s2718_s3 + $0x30] sm:$0xff]  ;;  %v1053_v15 = vld [vmem:[%s2720_s5 + $0x18] sm:$0xff] }
 0x194   : > { %v692_v45 = vadd.f32 %v2437_v1, %v447_v4  ;;  %v449_v1 = vld [vmem:[%s2718_s3 + $0x40] sm:$0xff]  ;;  %v452_v40 = vld [vmem:[%s2718_s3 + $0x58] sm:$0xff] }
 0x195   : > { %1778 = vmatpush3.bf16.msra.mxu1 %v2288_v42  ;;  %v1923_v42 = vld [vmem:[%s2719_s4 + $0x44] ss:$8 sps:$4 sm:$0xff]   ;;  %v1524_v31 = vmul.f32 -1.442695, %v668_v36  ;;  %v1527_v12 = vmul.f32 -1.442695, %v679_v30 }
 0x196   : > { %1779 = vmatprep.subr.bf16.mxu1 %v1008_v56  ;;  %v671_v56 = vadd.f32 %v2409_v50, %v442_v53  ;;  %v445_v50 = vld [vmem:[%s2718_s3 + $0x20] sm:$0xff]  ;;  %v1530_v48 = vmul.f32 -1.442695, %v692_v45 }
 0x197   : > { %1999 = vpow2.f32 %v1524_v31  ;;  %v684_v13 = vadd.f32 %v2427_v18, %v445_v50  ;;  %v448_v18 = vld [vmem:[%s2718_s3 + $0x38] sm:$0xff]  ;;  %v453_v45 = vld [vmem:[%s2718_s3 + $0x60] sm:$0xff] }
 0x198   : > { %v1525_v0 = vmul.f32 -1.442695, %v671_v56  ;;  %v695_v39 = vadd.f32 %v2442_v10, %v448_v18 }
 0x199   : > { %1780 = vmatpush3.bf16.msra.mxu1 %v2299_v46  ;;  %v1925_v46 = vld [vmem:[%s2719_s4 + $0x40] ss:$8 sps:$4 sm:$0xff]   ;;  %v1528_v22 = vmul.f32 -1.442695, %v684_v13 }
 0x19a   : > { %1781 = vmatprep.subr.bf16.mxu1 %v2722_v23  ;;  %2001 = vpow2.f32 %v1525_v0  ;;  %v1531_v23 = vmul.f32 -1.442695, %v695_v39  ;;  %v2095_v13 = vld [vmem:[#allocation2] sm:$0xff]  ;;  %v2096_v39 = vld [vmem:[#allocation2 + $0x8] sm:$0xff] }
 0x19b   : > { %2003 = vpow2.f32 %v1526_v41 }
 0x19c   : > { %2005 = vpow2.f32 %v1527_v12 }
 0x19d   : > { %1782 = vmatpush3.bf16.msra.mxu1 %v2309_v49  ;;  %v1926_v49 = vld [vmem:[%s2719_s4 + $0x54] ss:$8 sps:$4 sm:$0xff]   ;;  %2007 = vpow2.f32 %v1528_v22 }
 0x1a0   : > { %1179 = vmatmul.mubr.bf16.vlgmr.msra.gmra.mrb[16].mxu1 %v1911_v24  ;;  %v700_v24 = vadd.f32 %v2447_v52, %v449_v1  ;;  %v1052_v52 = vld [vmem:[%s2720_s5 + $0x10] sm:$0xff] }
 0x1a1   : > { %1186 = vmatprep.mubr.bf16.mxu1 %v1914_v25  ;;  %v2000_v32 = vpop.eup %1999 }
 0x1a2   : > { %v890_v44 = vadd.f32 1.0, %v2000_v32 }
 0x1a4   : > { %v2002_v26 = vpop.eup %2001  ;;  %2009 = vrcp.f32 %v890_v44 }
 0x1a5   : > { %v891_v16 = vadd.f32 1.0, %v2002_v26  ;;  %v2004_v37 = vpop.eup %2003  ;;  %2011 = vpow2.f32 %v1529_v34  ;;  %v1054_v26 = vld [vmem:[%s2720_s5 + $0x20] sm:$0xff] }
 0x1a6   : > { %v2006_v20 = vpop.eup %2005  ;;  %v892_v21 = vadd.f32 1.0, %v2004_v37 }
 0x1a7   : > { %2013 = vrcp.f32 %v891_v16  ;;  %v893_v25 = vadd.f32 1.0, %v2006_v20 }
 0x1a8   : > { %1187 = vmatmul.mubr.bf16.gmra.mrb[20].mxu1 %v1916_v27  ;;  %2015 = vpow2.f32 %v1530_v48  ;;  %v450_v27 = vld [vmem:[%s2718_s3 + $0x48] sm:$0xff] }
 0x1a9   : > { %1194 = vmatprep.mubr.bf16.mxu1 %v1917_v28 }
 0x1b0   : > { %1195 = vmatmul.mubr.bf16.gmra.mrb[24].mxu1 %v1919_v29  ;;  %v2008_v29 = vpop.eup %2007 }
 0x1b1   : > { %1202 = vmatprep.mubr.bf16.mxu1 %v1920_v33 }
 0x1b8   : > { %1203 = vmatmul.mubr.bf16.gmra.mrb[28].mxu1 %v1922_v38  ;;  %v2010_v38 = vpop.eup %2009 }
 0x1b9   : > { %1210 = vmatprep.mubr.bf16.mxu1 %v1923_v42  ;;  %v1532_v42 = vmul.f32 -1.442695, %v700_v24  ;;  %v1259_v53 = vsub.f32 1.0, %v2010_v38 }
 0x1bb   : > { %v1275_v61 = vmul.f32 %v2095_v13, %v1259_v53 }
 0x1c0   : > { %1211 = vmatmul.mubr.bf16.gmra.mrb[32].mxu1 %v1925_v46  ;;  %v703_v46 = vadd.f32 %v2452_v57, %v450_v27 }
 0x1c1   : > { %1218 = vmatprep.mubr.bf16.mxu1 %v1926_v49 }
 0x1c2   : > { %v1533_v6 = vmul.f32 -1.442695, %v703_v46 }
 0x1c8   : > { %1219 = vmatmul.mubr.bf16.gmra.mrb[36].mxu1 %v1928_v54  ;;  %v451_v54 = vld [vmem:[%s2718_s3 + $0x50] sm:$0xff] }
 0x1c9   : > { %1226 = vmatprep.mubr.bf16.mxu1 %v1929_v58  ;;  %v708_v0 = vadd.f32 %v2459_v5, %v451_v54  ;;  %v711_v5 = vadd.f32 %v2464_v9, %v452_v40  ;;  %v1056_v54 = vld [vmem:[%s2720_s5 + $0x30] sm:$0xff] }
 0x1cb   : > { %v1534_v22 = vmul.f32 -1.442695, %v708_v0 }
 0x1d0   : > { %1227 = vmatmul.mubr.bf16.gmra.mrb[40].mxu1 %v1931_v63 }
 0x1d1   : > { %1234 = vmatprep.mubr.bf16.mxu1 %v1932_v7  ;;  %v2012_v7 = vpop.eup %2011 }
 0x1d2   : > { %v2014_v57 = vpop.eup %2013  ;;  %v895_v2 = vadd.f32 1.0, %v2012_v7  ;;  %v455_v7 = vld [vmem:[%s2718_s3 + $0x70] sm:$0xff] }
 0x1d3   : > { %v2016_v41 = vpop.eup %2015  ;;  %v1260_v50 = vsub.f32 1.0, %v2014_v57 }
 0x1d8   : > { %1235 = vmatmul.mubr.bf16.gmra.mrb[44].mxu1 %v1934_v11  ;;  %v894_v11 = vadd.f32 1.0, %v2008_v29 }
 0x273   : > { %v1783_v17 = vpop.f32.mrb[16].mxu1 }
 0x274   : > { %v1784_v43 = vpop.f32.mrb[17].mxu1 }
 0x275   : > { %v1785_v19 = vadd.f32 %v1784_v43, %v1783_v17  ;;  %v1786_v51 = vpop.f32.mrb[18].mxu1  ;;  %v896_v17 = vadd.f32 1.0, %v2016_v41  ;;  %v1055_v43 = vld [vmem:[%s2720_s5 + $0x28] sm:$0xff] }
 0x276   : > { %v1787_v59 = vpop.f32.mrb[19].mxu1 }
 0x277   : > { %v1181_v10 = vadd.f32 %v1785_v19, %v1050_v8  ;;  %v1788_v62 = vadd.f32 %v1787_v59, %v1786_v51  ;;  %v1276_v8 = vmul.f32 %v2096_v39, %v1260_v50  ;;  %v716_v59 = vadd.f32 %v2471_v35, %v453_v45 }
 0x279   : > { %2017 = vtanh.f32 %v1181_v10  ;;  %v1184_v28 = vadd.f32 %v1788_v62, %v1051_v55  ;;  %v1535_v55 = vmul.f32 -1.442695, %v711_v5  ;;  %v1536_v46 = vmul.f32 -1.442695, %v716_v59 }
 0x27a   : > { %2019 = vrcp.f32 %v892_v21 }
 0x27b   : > { %2021 = vtanh.f32 %v1184_v28  ;;  %v1789_v33 = vpop.f32.mrb[20].mxu1 }
 0x27c   : > { %2023 = vpow2.f32 %v1531_v23  ;;  %v1790_v49 = vpop.f32.mrb[21].mxu1  ;;  %v454_v23 = vld [vmem:[%s2718_s3 + $0x68] sm:$0xff] }
 0x27d   : > { %2025 = vrcp.f32 %v893_v25  ;;  %v1791_v58 = vadd.f32 %v1790_v49, %v1789_v33  ;;  %v1792_v63 = vpop.f32.mrb[22].mxu1  ;;  %v2097_v33 = vld [vmem:[#allocation2 + $0x10] sm:$0xff] }
 0x27e   : > { %v1793_v36 = vpop.f32.mrb[23].mxu1  ;;  %2027 = vpow2.f32 %v1532_v42 }
 0x27f   : > { %v1189_v56 = vadd.f32 %v1791_v58, %v1052_v52  ;;  %v1794_v31 = vadd.f32 %v1793_v36, %v1792_v63  ;;  %v719_v52 = vadd.f32 %v2473_v47, %v454_v23 }
 0x281   : > { %2029 = vtanh.f32 %v1189_v56  ;;  %v1192_v30 = vadd.f32 %v1794_v31, %v1053_v15  ;;  %v2098_v56 = vld [vmem:[#allocation2 + $0x18] sm:$0xff]  ;;  %v1537_v50 = vmul.f32 -1.442695, %v719_v52  ;;  %v2101_v52 = vld [vmem:[#allocation2 + $0x30] sm:$0xff] }
 0x282   : > { %2031 = vrcp.f32 %v894_v11 }
 0x283   : > { %v2018_v12 = vpop.eup %2017  ;;  %2033 = vtanh.f32 %v1192_v30  ;;  %v1795_v32 = vpop.f32.mrb[24].mxu1 }
 0x284   : > { %v2020_v14 = vpop.eup %2019  ;;  %2035 = vpow2.f32 %v1533_v6  ;;  %v1291_v4 = vmul.f32 %v2018_v12, %v2010_v38  ;;  %v1796_v44 = vpop.f32.mrb[25].mxu1  ;;  %v1057_v6 = vld [vmem:[%s2720_s5 + $0x38] sm:$0xff]  ;;  %v724_v12 = vadd.f32 %v2483_v60, %v455_v7 }
 0x285   : > { %v2022_v34 = vpop.eup %2021  ;;  %2037 = vrcp.f32 %v895_v2  ;;  %v1797_v16 = vadd.f32 %v1796_v44, %v1795_v32  ;;  %v1798_v18 = vpop.f32.mrb[26].mxu1  ;;  %v1261_v51 = vsub.f32 1.0, %v2020_v14  ;;  %v456_v32 = vld [vmem:[%s2718_s3 + $0x78] sm:$0xff]  ;;  %v2099_v44 = vld [vmem:[#allocation2 + $0x20] sm:$0xff] }
 0x286   : > { %v2024_v37 = vpop.eup %2023  ;;  %v1307_v48 = vadd.f32 %v1291_v4, %v1275_v61  ;;  %v1292_v9 = vmul.f32 %v2022_v34, %v2014_v57  ;;  %v1799_v1 = vpop.f32.mrb[27].mxu1  ;;  %2039 = vpow2.f32 %v1534_v22 }
 0x287   : > { %v2026_v19 = vpop.eup %2025  ;;  %v1197_v20 = vadd.f32 %v1797_v16, %v1054_v26  ;;  %v1800_v21 = vadd.f32 %v1799_v1, %v1798_v18  ;;  %v897_v62 = vadd.f32 1.0, %v2024_v37  ;;  %v1277_v38 = vmul.f32 %v2097_v33, %v1261_v51  ;;  %v2100_v51 = vld [vmem:[#allocation2 + $0x28] sm:$0xff] }
 0x288   : > { %1323 = vst [vmem:[#allocation2] sm:$0xff] %v1307_v48  ;;  %v1308_v10 = vadd.f32 %v1292_v9, %v1276_v8  ;;  %v2028_v25 = vpop.eup %2027  ;;  %v1262_v27 = vsub.f32 1.0, %v2026_v19  ;;  %v1538_v16 = vmul.f32 -1.442695, %v724_v12  ;;  %v727_v18 = vadd.f32 %v2485_v3, %v456_v32  ;;  %v1059_v3 = vld [vmem:[%s2720_s5 + $0x48] sm:$0xff] }
 0x289   : > { %2041 = vtanh.f32 %v1197_v20  ;;  %v1200_v24 = vadd.f32 %v1800_v21, %v1055_v43  ;;  %v898_v57 = vadd.f32 1.0, %v2028_v25 }
 0x28a   : > { %2043 = vrcp.f32 %v896_v17  ;;  %1324 = vst [vmem:[#allocation2 + $0x8] sm:$0xff] %v1308_v10  ;;  %v1611_v28 = vpack.c.bf16 %v1308_v10, %v1307_v48  ;;  %v1278_v47 = vmul.f32 %v2098_v56, %v1262_v27  ;;  %v1058_v17 = vld [vmem:[%s2720_s5 + $0x40] sm:$0xff]  ;;  %v2102_v56 = vld [vmem:[#allocation2 + $0x38] sm:$0xff] }
 0x28b   : > { %v2030_v29 = vpop.eup %2029  ;;  %2045 = vtanh.f32 %v1200_v24  ;;  %v1801_v35 = vpop.f32.mrb[28].mxu1  ;;  %v1539_v24 = vmul.f32 -1.442695, %v727_v18 }
 0x28c   : > { %v2032_v42 = vpop.eup %2031  ;;  %2047 = vpow2.f32 %v1535_v55  ;;  %1612 = vst [vmem:[%s2170_s30] sm:$0xff] %v1611_v28   ;;  %v1293_v49 = vmul.f32 %v2030_v29, %v2020_v14  ;;  %v1802_v58 = vpop.f32.mrb[29].mxu1 }
 0x28d   : > { %v2034_v63 = vpop.eup %2033  ;;  %2049 = vrcp.f32 %v897_v62  ;;  %v1803_v11 = vadd.f32 %v1802_v58, %v1801_v35  ;;  %v1804_v15 = vpop.f32.mrb[30].mxu1  ;;  %v1263_v40 = vsub.f32 1.0, %v2032_v42  ;;  %v1060_v58 = vld [vmem:[%s2720_s5 + $0x50] sm:$0xff] }
 0x28e   : > { %v2036_v36 = vpop.eup %2035  ;;  %v1309_v53 = vadd.f32 %v1293_v49, %v1277_v38  ;;  %v1294_v31 = vmul.f32 %v2034_v63, %v2026_v19  ;;  %v1805_v0 = vpop.f32.mrb[31].mxu1  ;;  %2051 = vpow2.f32 %v1536_v46 }
 0x28f   : > { %v2038_v2 = vpop.eup %2037  ;;  %v1205_v30 = vadd.f32 %v1803_v11, %v1056_v54  ;;  %v1806_v41 = vadd.f32 %v1805_v0, %v1804_v15  ;;  %v899_v61 = vadd.f32 1.0, %v2036_v36  ;;  %v1279_v34 = vmul.f32 %v2099_v44, %v1263_v40 }
 0x290   : > { %1325 = vst [vmem:[#allocation2 + $0x10] sm:$0xff] %v1309_v53  ;;  %v1310_v13 = vadd.f32 %v1294_v31, %v1278_v47  ;;  %v2040_v22 = vpop.eup %2039  ;;  %v1264_v5 = vsub.f32 1.0, %v2038_v2 }
 0x291   : > { %2053 = vtanh.f32 %v1205_v30  ;;  %v1208_v14 = vadd.f32 %v1806_v41, %v1057_v6  ;;  %v900_v1 = vadd.f32 1.0, %v2040_v22  ;;  %v1061_v6 = vld [vmem:[%s2720_s5 + $0x58] sm:$0xff] }
 0x292   : > { %2055 = vrcp.f32 %v898_v57  ;;  %1326 = vst [vmem:[#allocation2 + $0x18] sm:$0xff] %v1310_v13  ;;  %v1616_v4 = vpack.c.bf16 %v1310_v13, %v1309_v53  ;;  %v1280_v20 = vmul.f32 %v2100_v51, %v1264_v5 }
 0x293   : > { %v2042_v26 = vpop.eup %2041  ;;  %2057 = vtanh.f32 %v1208_v14  ;;  %v1807_v60 = vpop.f32.mrb[32].mxu1 }
 0x294   : > { %v2044_v45 = vpop.eup %2043  ;;  %2059 = vpow2.f32 %v1537_v50  ;;  %1648 = vst [vmem:[%s2170_s30 + $0x8] sm:$0xff] %v1616_v4   ;;  %v1295_v37 = vmul.f32 %v2042_v26, %v2032_v42  ;;  %v1808_v48 = vpop.f32.mrb[33].mxu1  ;;  %v2103_v26 = vld [vmem:[#allocation2 + $0x40] sm:$0xff] }
 0x295   : > { %v2046_v39 = vpop.eup %2045  ;;  %2061 = vrcp.f32 %v899_v61  ;;  %v1809_v8 = vadd.f32 %v1808_v48, %v1807_v60  ;;  %v1810_v9 = vpop.f32.mrb[34].mxu1  ;;  %v1265_v23 = vsub.f32 1.0, %v2044_v45  ;;  %v1062_v60 = vld [vmem:[%s2720_s5 + $0x60] sm:$0xff] }
 0x296   : > { %v2048_v43 = vpop.eup %2047  ;;  %v1311_v19 = vadd.f32 %v1295_v37, %v1279_v34  ;;  %v1296_v21 = vmul.f32 %v2046_v39, %v2038_v2  ;;  %v1811_v55 = vpop.f32.mrb[35].mxu1  ;;  %2063 = vpow2.f32 %v1538_v16 }
 0x297   : > { %v2050_v59 = vpop.eup %2049  ;;  %v1213_v10 = vadd.f32 %v1809_v8, %v1058_v17  ;;  %v1812_v62 = vadd.f32 %v1811_v55, %v1810_v9  ;;  %v901_v27 = vadd.f32 1.0, %v2048_v43  ;;  %v1281_v49 = vmul.f32 %v2101_v52, %v1265_v23  ;;  %v2104_v8 = vld [vmem:[#allocation2 + $0x48] sm:$0xff] }
 0x298   : > { %1327 = vst [vmem:[#allocation2 + $0x20] sm:$0xff] %v1311_v19  ;;  %v1312_v25 = vadd.f32 %v1296_v21, %v1280_v20  ;;  %v2052_v29 = vpop.eup %2051  ;;  %v1266_v33 = vsub.f32 1.0, %v2050_v59 }
 0x299   : > { %2065 = vtanh.f32 %v1213_v10  ;;  %v1216_v28 = vadd.f32 %v1812_v62, %v1059_v3  ;;  %v902_v57 = vadd.f32 1.0, %v2052_v29 }
 0x29a   : > { %2067 = vrcp.f32 %v900_v1  ;;  %1328 = vst [vmem:[#allocation2 + $0x28] sm:$0xff] %v1312_v25  ;;  %v1621_v38 = vpack.c.bf16 %v1312_v25, %v1311_v19  ;;  %v1282_v47 = vmul.f32 %v2102_v56, %v1266_v33  ;;  %v1063_v1 = vld [vmem:[%s2720_s5 + $0x68] sm:$0xff] }
 0x29b   : > { %v2054_v35 = vpop.eup %2053  ;;  %2069 = vtanh.f32 %v1216_v28  ;;  %v1813_v42 = vpop.f32.mrb[36].mxu1  ;;  %v2105_v28 = vld [vmem:[#allocation2 + $0x50] sm:$0xff] }
 0x29c   : > { %v2056_v46 = vpop.eup %2055  ;;  %2071 = vpow2.f32 %v1539_v24  ;;  %1649 = vst [vmem:[%s2170_s30 + $0x10] sm:$0xff] %v1621_v38   ;;  %v1297_v54 = vmul.f32 %v2054_v35, %v2044_v45  ;;  %v1814_v63 = vpop.f32.mrb[37].mxu1  ;;  %v1064_v38 = vld [vmem:[%s2720_s5 + $0x70] sm:$0xff] }
 0x29d   : > { %v2058_v7 = vpop.eup %2057  ;;  %2073 = vrcp.f32 %v901_v27  ;;  %v1815_v11 = vadd.f32 %v1814_v63, %v1813_v42  ;;  %v1816_v15 = vpop.f32.mrb[38].mxu1  ;;  %v1267_v41 = vsub.f32 1.0, %v2056_v46 }
 0x29e   : > { %v2060_v36 = vpop.eup %2059  ;;  %v1313_v53 = vadd.f32 %v1297_v54, %v1281_v49  ;;  %v1298_v31 = vmul.f32 %v2058_v7, %v2050_v59  ;;  %v1817_v0 = vpop.f32.mrb[39].mxu1  ;;  %v2106_v54 = vld [vmem:[#allocation2 + $0x58] sm:$0xff] }
 0x29f   : > { %v2062_v2 = vpop.eup %2061  ;;  %v1221_v40 = vadd.f32 %v1815_v11, %v1060_v58  ;;  %v1818_v30 = vadd.f32 %v1817_v0, %v1816_v15  ;;  %v903_v12 = vadd.f32 1.0, %v2060_v36  ;;  %v1283_v44 = vmul.f32 %v2103_v26, %v1267_v41  ;;  %v1065_v7 = vld [vmem:[%s2720_s5 + $0x78] sm:$0xff] }
 0x2a0   : > { %1329 = vst [vmem:[#allocation2 + $0x30] sm:$0xff] %v1313_v53  ;;  %v1314_v50 = vadd.f32 %v1298_v31, %v1282_v47  ;;  %v2064_v61 = vpop.eup %2063  ;;  %v1268_v32 = vsub.f32 1.0, %v2062_v2 }
 0x2a1   : > { %2075 = vtanh.f32 %v1221_v40  ;;  %v1224_v13 = vadd.f32 %v1818_v30, %v1061_v6  ;;  %v904_v48 = vadd.f32 1.0, %v2064_v61  ;;  %v2107_v40 = vld [vmem:[#allocation2 + $0x60] sm:$0xff] }
 0x2a2   : > { %2077 = vrcp.f32 %v902_v57  ;;  %1330 = vst [vmem:[#allocation2 + $0x38] sm:$0xff] %v1314_v50  ;;  %v1626_v14 = vpack.c.bf16 %v1314_v50, %v1313_v53  ;;  %v1284_v9 = vmul.f32 %v2104_v8, %v1268_v32 }
 0x2a3   : > { %v2066_v22 = vpop.eup %2065  ;;  %2079 = vtanh.f32 %v1224_v13  ;;  %v1819_v5 = vpop.f32.mrb[40].mxu1  ;;  %v2108_v13 = vld [vmem:[#allocation2 + $0x68] sm:$0xff] }
 0x2a4   : > { %v2068_v4 = vpop.eup %2067  ;;  %1650 = vst [vmem:[%s2170_s30 + $0x18] sm:$0xff] %v1626_v14   ;;  %v1299_v34 = vmul.f32 %v2066_v22, %v2056_v46  ;;  %v1820_v45 = vpop.f32.mrb[41].mxu1  ;;  %2081 = vrcp.f32 %v903_v12 }
 0x2a5   : > { %v2070_v16 = vpop.eup %2069  ;;  %v1821_v18 = vadd.f32 %v1820_v45, %v1819_v5  ;;  %v1822_v37 = vpop.f32.mrb[42].mxu1  ;;  %v1269_v3 = vsub.f32 1.0, %v2068_v4 }
 0x2a6   : > { %v2072_v17 = vpop.eup %2071  ;;  %v1315_v39 = vadd.f32 %v1299_v34, %v1283_v44  ;;  %v1300_v43 = vmul.f32 %v2070_v16, %v2062_v2  ;;  %v1823_v19 = vpop.f32.mrb[43].mxu1  ;;  %v2109_v34 = vld [vmem:[#allocation2 + $0x70] sm:$0xff] }
 0x2a7   : > { %v2074_v51 = vpop.eup %2073  ;;  %v1229_v20 = vadd.f32 %v1821_v18, %v1062_v60  ;;  %v1824_v21 = vadd.f32 %v1823_v19, %v1822_v37  ;;  %v905_v59 = vadd.f32 1.0, %v2072_v17  ;;  %v1285_v29 = vmul.f32 %v2105_v28, %v1269_v3  ;;  %v2110_v37 = vld [vmem:[#allocation2 + $0x78] sm:$0xff] }
 0x2a8   : > { %1331 = vst [vmem:[#allocation2 + $0x40] sm:$0xff] %v1315_v39  ;;  %v1316_v55 = vadd.f32 %v1300_v43, %v1284_v9  ;;  %v1270_v62 = vsub.f32 1.0, %v2074_v51 }
 0x2a9   : > { %2083 = vtanh.f32 %v1229_v20  ;;  %v1232_v10 = vadd.f32 %v1824_v21, %v1063_v1 }
 0x2aa   : > { %2085 = vrcp.f32 %v904_v48  ;;  %1332 = vst [vmem:[#allocation2 + $0x48] sm:$0xff] %v1316_v55  ;;  %v1631_v23 = vpack.c.bf16 %v1316_v55, %v1315_v39  ;;  %v1286_v58 = vmul.f32 %v2106_v54, %v1270_v62 }
 0x2ab   : > { %v2076_v24 = vpop.eup %2075  ;;  %2087 = vtanh.f32 %v1232_v10  ;;  %v1825_v25 = vpop.f32.mrb[44].mxu1 }
 0x2ac   : > { %v2078_v27 = vpop.eup %2077  ;;  %1651 = vst [vmem:[%s2170_s30 + $0x20] sm:$0xff] %v1631_v23   ;;  %v1301_v33 = vmul.f32 %v2076_v24, %v2068_v4  ;;  %v1826_v35 = vpop.f32.mrb[45].mxu1  ;;  %2089 = vrcp.f32 %v905_v59 }
 0x2ad   : > { %v2080_v42 = vpop.eup %2079  ;;  %v1827_v46 = vadd.f32 %v1826_v35, %v1825_v25  ;;  %v1828_v52 = vpop.f32.mrb[46].mxu1  ;;  %v1271_v53 = vsub.f32 1.0, %v2078_v27 }
 0x2ae   : > { %v1317_v49 = vadd.f32 %v1301_v33, %v1285_v29  ;;  %v1302_v63 = vmul.f32 %v2080_v42, %v2074_v51  ;;  %v1829_v11 = vpop.f32.mrb[47].mxu1  ;;  %v2082_v15 = vpop.eup %2081 }
 0x2af   : > { %v1237_v36 = vadd.f32 %v1827_v46, %v1064_v38  ;;  %v1830_v57 = vadd.f32 %v1829_v11, %v1828_v52  ;;  %v1272_v31 = vsub.f32 1.0, %v2082_v15  ;;  %v1287_v30 = vmul.f32 %v2107_v40, %v1271_v53 }
 0x2b0   : > { %1333 = vst [vmem:[#allocation2 + $0x50] sm:$0xff] %v1317_v49  ;;  %v1318_v56 = vadd.f32 %v1302_v63, %v1286_v58 }
 0x2b1   : > { %2091 = vtanh.f32 %v1237_v36  ;;  %v1240_v47 = vadd.f32 %v1830_v57, %v1065_v7  ;;  %v1288_v61 = vmul.f32 %v2108_v13, %v1272_v31 }
 0x2b2   : > { %1334 = vst [vmem:[#allocation2 + $0x58] sm:$0xff] %v1318_v56  ;;  %v1636_v6 = vpack.c.bf16 %v1318_v56, %v1317_v49 }
 0x2b3   : > { %v2084_v0 = vpop.eup %2083  ;;  %2093 = vtanh.f32 %v1240_v47 }
 0x2b4   : > { %v2086_v2 = vpop.eup %2085  ;;  %1652 = vst [vmem:[%s2170_s30 + $0x28] sm:$0xff] %v1636_v6   ;;  %v1303_v41 = vmul.f32 %v2084_v0, %v2078_v27 }
 0x2b5   : > { %v2088_v50 = vpop.eup %2087  ;;  %v1273_v22 = vsub.f32 1.0, %v2086_v2 }
 0x2b6   : > { %v1319_v12 = vadd.f32 %v1303_v41, %v1287_v30  ;;  %v1304_v32 = vmul.f32 %v2088_v50, %v2082_v15  ;;  %v2090_v14 = vpop.eup %2089 }
 0x2b7   : > { %v1274_v4 = vsub.f32 1.0, %v2090_v14  ;;  %v1289_v60 = vmul.f32 %v2109_v34, %v1273_v22 }
 0x2b8   : > { %1335 = vst [vmem:[#allocation2 + $0x60] sm:$0xff] %v1319_v12  ;;  %v1320_v5 = vadd.f32 %v1304_v32, %v1288_v61 }
 0x2b9   : > { %v1290_v17 = vmul.f32 %v2110_v37, %v1274_v4 }
 0x2ba   : > { %1336 = vst [vmem:[#allocation2 + $0x68] sm:$0xff] %v1320_v5  ;;  %v1641_v26 = vpack.c.bf16 %v1320_v5, %v1319_v12 }
 0x2bb   : > { %v2092_v44 = vpop.eup %2091 }
 0x2bc   : > { %1653 = vst [vmem:[%s2170_s30 + $0x30] sm:$0xff] %v1641_v26   ;;  %v1305_v45 = vmul.f32 %v2092_v44, %v2086_v2 }
 0x2bd   : > { %v2094_v16 = vpop.eup %2093 }
 0x2be   : > { %v1321_v18 = vadd.f32 %v1305_v45, %v1289_v60  ;;  %v1306_v48 = vmul.f32 %v2094_v16, %v2090_v14 }
 0x2c0   : > { %1337 = vst [vmem:[#allocation2 + $0x70] sm:$0xff] %v1321_v18  ;;  %v1322_v39 = vadd.f32 %v1306_v48, %v1290_v17 }
 0x2c2   : > { %1338 = vst [vmem:[#allocation2 + $0x78] sm:$0xff] %v1322_v39  ;;  %v1646_v8 = vpack.c.bf16 %v1322_v39, %v1321_v18 }
 0x2c4   : > { %1654 = vst [vmem:[%s2170_s30 + $0x38] sm:$0xff] %v1646_v8  }
 0x2c5 PF: > { %s16_s21 = sadd.s32 1, %s2117_s21  }
 0x2c6   : > { %p13_p5 = scmp.ge.s32.totalorder %s16_s21, 5  }
 0x2c8   :  { %15 = sbr.rel (!%p13_p5) target bundleno = 1 (0x1), region = 78 }

// kernel: evolve_gcn_forward.11
= control target key start
LH: loop header
LB: loop body
LE: loop exit
PB: predicated region body
PF: predicated region fallthrough
CT: control target
= control target key end

     0   :  { %s742_s12 = smov 0   ;;  %s744_s13 = smov 0   ;;  %s800_s0 = inlined_call_operand.vmem [shape: f32[3,16,16], index: 0, kind: input, shape index: {}]   ;;  %s801_s1 = inlined_call_operand.vmem [shape: bf16[3,16,128], index: 1, kind: input, shape index: {}]   ;;  %s802_s2 = inlined_call_operand.vmem [shape: bf16[3,128,128], index: 2, kind: input, shape index: {}]   ;;  %s803_s3 = inlined_call_operand.vmem [shape: f32[3,16,128], index: 3, kind: output, shape index: {}]  }
   0x1   :  { %s746_s14 = smov 0  }
   0x2 LB: > { %s32_s15 = sadd.s32 1, %s714_s13  ;;  %p599_p0 = scmp.ge.s32.totalorder %s718_s14, 1  ;;  %s718_s14 = sphi %s746_s14, %s13_s14   ;;  %s714_s13 = sphi %s744_s13, %s805_s13   ;;  %s710_s12 = sphi %s742_s12, %s804_s12  }
   0x3   : > { %p34_p1 = scmp.ge.s32.totalorder %s32_s15, 3  ;;  %p197_p2 = scmp.lt.s32.totalorder %s718_s14, 4 }
   0x5   : > { %s807_s15 = smov (%p34_p1, %s32_s15), 0  ;;  %p198_p3 = pnand %p599_p0, %p197_p2 }
   0x6   : > { %p247_p4 = scmp.lt.s32.totalorder (!%p198_p3), %s710_s12, 2  ;;  %v720_v0 = vmov (!%p198_p3), 0.0   ;;  %vm721_vm0 = vmmov (!%p198_p3), 0   ;;  %vm304_vm1 = vcmask (!%p198_p3), 130048  }
   0x7   : > { %201 = sbr.rel (%p198_p3) target bundleno = 456 (0x1c8), region = 32  ;;  %635 = vmatprep.subr.bf16.mxu0 (!%p198_p3), %v720_v0  ;;  %637 = vmatprep.mubr.msk.bf16.mxu0 (!%p198_p3), %vm721_vm0, %v720_v0 }
   0x8   : > { %641 = vmatprep.subr.bf16.mxu1 (!%p198_p3), %v720_v0  ;;  %657 = vmatprep.mubr.msk.bf16.mxu1 (!%p198_p3), %vm721_vm0, %v720_v0 }
   0xe   : > { %s809_s12 = smov (!%p247_p4, %s710_s12), 2 }
   0xf   : > { %s621_s16 = sshll.u32 %s809_s12, 3  ;;  %s622_s17 = sshll.u32 %s809_s12, 6 }
  0x10   : > { %s267_s20 = scalar_lea.vmem %s801_s1, %s621_s16  ;;  %s770_s23 = scalar_lea.vmem %s802_s2, %s622_s17 }
  0x11   : > { %v687_v1 = vld [vmem:[%s267_s20] sm:$0xff]   ;;  %s620_s24 = sshll.u32 %s809_s12, 4  ;;  %v689_v6 = vld [vmem:[%s770_s23 + $0x8] sm:$0xff]   ;;  %v690_v7 = vld [vmem:[%s770_s23 + $0x10] sm:$0xff]  }
  0x12   : > { %s257_s27 = scalar_lea.vmem %s800_s0, %s620_s24  ;;  %v688_v2 = vld [vmem:[%s770_s23] sm:$0xff]   ;;  %636 = vmatpush3.bf16.msra.mxu0 %v687_v1  ;;  %v691_v8 = vld [vmem:[%s770_s23 + $0x18] sm:$0xff]   ;;  %v693_v10 = vld [vmem:[%s770_s23 + $0x28] sm:$0xff]   ;;  %s282_s30 = scalar_lea.vmem %s803_s3, %s620_s24 }
  0x13   : > { %v291_v3 = vld [vmem:[%s257_s27] sm:$0xff]  ;;  %v292_v4 = vld [vmem:[%s257_s27 + $0x8] sm:$0xff]  ;;  %642 = vmatpush3.bf16.msra.mxu1 %v688_v2  ;;  %v694_v11 = vld [vmem:[%s770_s23 + $0x30] sm:$0xff]  }
  0x14   : > { %v293_v5 = vpack.c.bf16 %v292_v4, %v291_v3  ;;  %643 = vmatprep.subr.bf16.mxu1 %v720_v0  ;;  %v692_v9 = vld [vmem:[%s770_s23 + $0x20] sm:$0xff]   ;;  %v695_v12 = vld [vmem:[%s770_s23 + $0x38] sm:$0xff]  }
  0x16   : > { %638 = vmatmul.mubr.msk.bf16.vlgmr.msra.gmra.mrb[0].mxu0 %vm304_vm1, %v293_v5 }
  0x17   : > { %644 = vmatpush3.bf16.msra.mxu1 %v689_v6 }
  0x18   : > { %645 = vmatprep.subr.bf16.mxu1 %v720_v0 }
  0x1b   : > { %646 = vmatpush3.bf16.msra.mxu1 %v690_v7 }
  0x1c   : > { %647 = vmatprep.subr.bf16.mxu1 %v720_v0 }
  0x1f   : > { %648 = vmatpush3.bf16.msra.mxu1 %v691_v8 }
  0x20   : > { %649 = vmatprep.subr.bf16.mxu1 %v720_v0 }
  0x23   : > { %650 = vmatpush3.bf16.msra.mxu1 %v692_v9 }
  0x24   : > { %651 = vmatprep.subr.bf16.mxu1 %v720_v0 }
  0x27   : > { %652 = vmatpush3.bf16.msra.mxu1 %v693_v10 }
  0x28   : > { %653 = vmatprep.subr.bf16.mxu1 %v720_v0 }
  0x2b   : > { %654 = vmatpush3.bf16.msra.mxu1 %v694_v11 }
  0x2c   : > { %655 = vmatprep.subr.bf16.mxu1 %v720_v0 }
  0x2f   : > { %656 = vmatpush3.bf16.msra.mxu1 %v695_v12 }
  0xe9   : > { %v342_v13 = vpop.f32.mrb[0].mxu0 }
  0xea   : > { %v639_v14 = vpop.f32.mrb[1].mxu0 }
  0xeb   : > { %v345_v15 = vpop.f32.mrb[2].mxu0 }
  0xec   : > { %v358_v16 = vpack.c.bf16 %v345_v15, %v342_v13  ;;  %v640_v17 = vpop.f32.mrb[3].mxu0 }
  0xee   : > { %658 = vmatmul.mubr.bf16.vlgmr.msra.gmra.mrb[0].mxu1 %v358_v16 }
 0x1c1   : > { %v457_v18 = vpop.f32.mrb[0].mxu1 }
 0x1c2   : > { %vm464_vm2 = vcmp.ge.f32.partialorder %v457_v18, 0.0  ;;  %v466_v19 = vmul.f32 0.22916667, %v457_v18  ;;  %v659_v20 = vpop.f32.mrb[1].mxu1 }
 0x1c3   : > { %v460_v21 = vpop.f32.mrb[2].mxu1 }
 0x1c4   : > { %v468_v22 = vsel %vm464_vm2, %v457_v18, %v466_v19  ;;  %vm465_vm3 = vcmp.ge.f32.partialorder %v460_v21, 0.0  ;;  %v467_v23 = vmul.f32 0.22916667, %v460_v21  ;;  %v660_v24 = vpop.f32.mrb[3].mxu1 }
 0x1c5   : > { %470 = vst [vmem:[%s282_s30] sm:$0xff] %v468_v22 }
 0x1c6   : > { %v469_v25 = vsel %vm465_vm3, %v460_v21, %v467_v23 }
 0x1c7   : > { %471 = vst [vmem:[%s282_s30 + $0x8] sm:$0xff] %v469_v25 }
 0x1c8 PF: > { %s13_s14 = sadd.s32 1, %s718_s14   ;;  %s804_s12 = smov %s714_s13 }
 0x1c9   : > { %p10_p5 = scmp.ge.s32.totalorder %s13_s14, 5   ;;  %s805_s13 = smov %s807_s15 }
 0x1cb   :  { %12 = sbr.rel (!%p10_p5) target bundleno = 2 (0x2), region = 76 }

</bundles_post_ra>
